<compile_context>
chip_gen: v5e
topology: v5e:2x2
jax: 0.10.0
libtpu: 0.0.40
codegen_flags: <defaults>
</compile_context>

<pallas_src>
import functools
import math

import jax
import jax.numpy as jnp
from jax import lax
from jax.experimental import pallas as pl
from jax.experimental.pallas import tpu as pltpu


def _round_up(x, m):
    return (x + m - 1) // m * m


# ----------------------------------------------------------------------------
# Core kernel: out = x @ w_masked.T + bias   (optionally fused ReLU)
# ----------------------------------------------------------------------------
def _matmul_bias_kernel(x_ref, w_ref, b_ref, o_ref, acc_ref, *, apply_relu):
    k = pl.program_id(2)

    @pl.when(k == 0)
    def _():
        acc_ref[...] = jnp.zeros_like(acc_ref)

    # x (tm, tk) · w (tn, tk) contracted on the last dims -> (tm, tn) in f32.
    acc_ref[...] += lax.dot_general(
        x_ref[...],
        w_ref[...],
        dimension_numbers=(((1,), (1,)), ((), ())),
        preferred_element_type=jnp.float32,
    )

    @pl.when(k == pl.num_programs(2) - 1)
    def _():
        out = acc_ref[...] + b_ref[...]        # f32 epilogue (bias, ReLU)
        if apply_relu:
            out = jnp.maximum(out, 0.0)
        o_ref[...] = out.astype(o_ref.dtype)


def pruned_linear(x, w_masked, bias, *, apply_relu=False, compute_dtype=jnp.bfloat16):
    """out = x @ w_masked.T + bias (optionally fused ReLU).

    x: (M, K) f32; w_masked: (N, K) f32 (mask already applied); bias: (N,) f32.
    Operands are cast to `compute_dtype` for the MXU; accumulation is f32.
    Returns (M, N) f32.
    """
    M, K = x.shape
    N = w_masked.shape[0]

    sub = 16 if compute_dtype == jnp.bfloat16 else 8   # sublane multiple per dtype

    # Tile caps: lane dims (tk, tn) multiples of 128, sublane dims multiples of
    # `sub`. (512, 512, 1024) bf16 double-buffered is ~7 MiB — fits v5e/v6e and
    # v7x (64 MiB/TC, 32 MiB scoped default) with headroom.
    tm = min(512, _round_up(M, sub))
    tn = min(512, _round_up(N, 128))
    tk = min(1024, _round_up(K, 128))

    # Guarantee >=2 blocks on a "parallel" axis when possible so both v7x
    # TensorCores get work (also harmless elsewhere).
    if (_round_up(M, tm) // tm) * (_round_up(N, tn) // tn) < 2 and M > sub and tm > sub:
        tm = _round_up((M + 1) // 2, sub)

    M_p, N_p, K_p = _round_up(M, tm), _round_up(N, tn), _round_up(K, tk)

    x_c = x.astype(compute_dtype)
    w_c = w_masked.astype(compute_dtype)

    x_p = jnp.pad(x_c, ((0, M_p - M), (0, K_p - K))) if (M_p, K_p) != (M, K) else x_c
    w_p = jnp.pad(w_c, ((0, N_p - N), (0, K_p - K))) if (N_p, K_p) != (N, K) else w_c
    b_p = (jnp.pad(bias, (0, N_p - N)) if N_p != N else bias).reshape(1, N_p)
    b_p = b_p.astype(jnp.float32)

    grid = (M_p // tm, N_p // tn, K_p // tk)

    bytes_accessed = (x_p.size * x_p.dtype.itemsize
                      + w_p.size * w_p.dtype.itemsize
                      + M_p * N_p * 4)

    out = pl.pallas_call(
        functools.partial(_matmul_bias_kernel, apply_relu=apply_relu),
        out_shape=jax.ShapeDtypeStruct((M_p, N_p), jnp.float32),
        grid_spec=pltpu.PrefetchScalarGridSpec(
            num_scalar_prefetch=0,
            grid=grid,
            in_specs=[
                pl.BlockSpec((tm, tk), lambda i, j, k: (i, k)),   # activations
                pl.BlockSpec((tn, tk), lambda i, j, k: (j, k)),   # masked weights
                pl.BlockSpec((1, tn), lambda i, j, k: (0, j)),    # bias (f32)
            ],
            out_specs=pl.BlockSpec((tm, tn), lambda i, j, k: (i, j)),
            scratch_shapes=[pltpu.VMEM((tm, tn), jnp.float32)],
        ),
        compiler_params=pltpu.CompilerParams(
            dimension_semantics=("parallel", "parallel", "arbitrary")),
        cost_estimate=pl.CostEstimate(
            flops=2 * M_p * N_p * K_p,
            transcendentals=0,
            bytes_accessed=bytes_accessed),
    )(x_p, w_p, b_p)

    return out[:M, :N]


# ----------------------------------------------------------------------------
# Pruned VGG layers built on the kernel (NHWC activation layout)
# ----------------------------------------------------------------------------
def _im2col_nhwc(x, kh, kw, stride, padding):
    """NHWC -> (B*H_out*W_out, kh*kw*C) patches, column order (kh, kw, C)."""
    # TODO(synk): patch extraction is plain-JAX layout plumbing around the Pallas
    # matmul (no MXU work); a fully implicit-GEMM conv would fuse it via shifted
    # windows but is not implemented here.
    B, H, W, C = x.shape
    xp = jnp.pad(x, ((0, 0), (padding, padding), (padding, padding), (0, 0)))
    Hp, Wp = H + 2 * padding, W + 2 * padding
    H_out = (Hp - kh) // stride + 1
    W_out = (Wp - kw) // stride + 1
    cols = []
    for di in range(kh):
        for dj in range(kw):
            cols.append(xp[:, di:di + stride * H_out:stride,
                           dj:dj + stride * W_out:stride, :])
    patches = jnp.stack(cols, axis=3)                       # (B, Ho, Wo, kh*kw, C)
    return patches.reshape(B * H_out * W_out, kh * kw * C), H_out, W_out


def conv2d_w_forward_nhwc(x, weight, weight_aux, bias, *, stride=1, padding=1,
                          apply_relu=False, compute_dtype=jnp.bfloat16):
    """Conv2DLayerW forward (groups=1, dilation=1), NHWC in / NHWC out."""
    B, H, W, C = x.shape
    O, _, kh, kw = weight.shape
    patches, H_out, W_out = _im2col_nhwc(x, kh, kw, stride, padding)
    # Prune mask applied once here (not per grid step in the kernel).
    w_masked = weight * (weight_aux > 0).astype(weight.dtype)
    # Reorder weights to (O, kh*kw*C) to match the patch column order.
    w_flat = jnp.transpose(w_masked, (0, 2, 3, 1)).reshape(O, kh * kw * C)
    out = pruned_linear(patches, w_flat, bias, apply_relu=apply_relu,
                        compute_dtype=compute_dtype)
    return out.reshape(B, H_out, W_out, O)


def linear_w_forward(x, weight, weight_aux, bias, *, apply_relu=False,
                     compute_dtype=jnp.bfloat16):
    """LinearLayerW forward."""
    w_masked = weight * (weight_aux > 0).astype(weight.dtype)
    return pruned_linear(x, w_masked, bias, apply_relu=apply_relu,
                         compute_dtype=compute_dtype)


def max_pool_2x2_nhwc(x):
    # TODO(synk): 2x2/2 max-pool kept as a plain-JAX reshape+max (pure memory op).
    B, H, W, C = x.shape
    return x.reshape(B, H // 2, 2, W // 2, 2, C).max(axis=(2, 4))


def vgg_forward(x, params, *, compute_dtype=jnp.bfloat16):
    """Small weight-pruned VGG: ConvW->ReLU->Pool x2, flatten, LinW->ReLU->LinW.

    x is NCHW (PyTorch layout); activations run NHWC internally and are put back
    in NCHW ordering only for the flatten, matching torch .view(B, -1).
    """
    x = jnp.transpose(x, (0, 2, 3, 1))                         # NCHW -> NHWC once
    x = conv2d_w_forward_nhwc(x, *params["conv1"], padding=1, apply_relu=True,
                              compute_dtype=compute_dtype)
    x = max_pool_2x2_nhwc(x)
    x = conv2d_w_forward_nhwc(x, *params["conv2"], padding=1, apply_relu=True,
                              compute_dtype=compute_dtype)
    x = max_pool_2x2_nhwc(x)
    x = jnp.transpose(x, (0, 3, 1, 2)).reshape(x.shape[0], -1)  # torch .view(B,-1)
    x = linear_w_forward(x, *params["fc1"], apply_relu=True,
                         compute_dtype=compute_dtype)
    x = linear_w_forward(x, *params["fc2"], apply_relu=False,
                         compute_dtype=compute_dtype)
    return x


# ----------------------------------------------------------------------------
# Parameter init (mirrors the PyTorch layer distributions; aux shifted so the
# pruning gate actually has both signs in the test)
# ----------------------------------------------------------------------------
def init_conv_params(key, in_ch, out_ch, k, dtype=jnp.float32):
    kw_, ka_, kb_ = jax.random.split(key, 3)
    fan_in = in_ch * k * k
    bound = 1.0 / math.sqrt(fan_in)     # kaiming_uniform_(a=sqrt(5)) bound
    weight = jax.random.uniform(kw_, (out_ch, in_ch, k, k), dtype, -bound, bound)
    weight_aux = jax.random.uniform(ka_, (out_ch, in_ch, k, k), dtype) - 0.5
    bias = jax.random.uniform(kb_, (out_ch,), dtype, -bound, bound)
    return weight, weight_aux, bias


def init_linear_params(key, size_in, size_out, dtype=jnp.float32):
    kw_, ka_, kb_ = jax.random.split(key, 3)
    bound = 1.0 / math.sqrt(size_in)
    weight = jax.random.uniform(kw_, (size_out, size_in), dtype, -bound, bound)
    weight_aux = jax.random.uniform(ka_, (size_out, size_in), dtype) - 0.5
    bias = jax.random.uniform(kb_, (size_out,), dtype, -bound, bound)
    return weight, weight_aux, bias


# ----------------------------------------------------------------------------
# Pure-JAX reference (f32, NCHW — same math as the PyTorch module)
# ----------------------------------------------------------------------------
def _max_pool_2x2_nchw(x):
    B, C, H, W = x.shape
    return x.reshape(B, C, H // 2, 2, W // 2, 2).max(axis=(3, 5))


def vgg_reference(x, params):
    def conv_ref(x, w, wa, b, padding):
        mask = (wa > 0).astype(w.dtype)
        y = lax.conv_general_dilated(
            x, w * mask, window_strides=(1, 1),
            padding=[(padding, padding), (padding, padding)],
            dimension_numbers=("NCHW", "OIHW", "NCHW"))
        return y + b[None, :, None, None]

    def lin_ref(x, w, wa, b):
        mask = (wa > 0).astype(w.dtype)
        return x @ (w * mask).T + b

    y = jax.nn.relu(conv_ref(x, *params["conv1"], 1))
    y = _max_pool_2x2_nchw(y)
    y = jax.nn.relu(conv_ref(y, *params["conv2"], 1))
    y = _max_pool_2x2_nchw(y)
    y = y.reshape(y.shape[0], -1)
    y = jax.nn.relu(lin_ref(y, *params["fc1"]))
    y = lin_ref(y, *params["fc2"])
    return y


if __name__ == "__main__":
    key = jax.random.PRNGKey(0)
    kx, k1, k2, k3, k4 = jax.random.split(key, 5)

    B, C, H, W = 2, 3, 16, 16
    num_classes = 10
    x = jax.random.normal(kx, (B, C, H, W), dtype=jnp.float32)

    params = {
        "conv1": init_conv_params(k1, 3, 16, 3),
        "conv2": init_conv_params(k2, 16, 32, 3),
        "fc1": init_linear_params(k3, 32 * 4 * 4, 64),
        "fc2": init_linear_params(k4, 64, num_classes),
    }

    ref = vgg_reference(x, params)

    # 1) f32 compute path: exact-semantics check against the f32 reference.
    out_f32 = jax.jit(functools.partial(vgg_forward, compute_dtype=jnp.float32))(x, params)
    jax.block_until_ready(out_f32)
    assert out_f32.shape == (B, num_classes)
    err32 = float(jnp.max(jnp.abs(out_f32 - ref)))
    assert jnp.allclose(out_f32, ref, atol=1e-3, rtol=1e-3), f"f32 max abs err {err32}"

    # 2) bf16 compute path (the performance path: MXU-native operands, f32 acc).
    out_bf16 = jax.jit(functools.partial(vgg_forward, compute_dtype=jnp.bfloat16))(x, params)
    jax.block_until_ready(out_bf16)
    assert out_bf16.shape == (B, num_classes)
    err16 = float(jnp.max(jnp.abs(out_bf16 - ref)))
    assert jnp.allclose(out_bf16, ref, atol=5e-2, rtol=5e-2), f"bf16 max abs err {err16}"

    print("KERNEL_OK")
</pallas_src>

<mosaic_0001>
module attributes {stable_mosaic.version = 11 : i64} {
  func.func @_matmul_bias_kernel(%arg0: i32, %arg1: i32, %arg2: i32, %arg3: memref<256x128xf32, #tpu.memory_space<vmem>>, %arg4: memref<128x128xf32, #tpu.memory_space<vmem>>, %arg5: memref<1x128xf32, #tpu.memory_space<vmem>>, %arg6: memref<256x128xf32, #tpu.memory_space<vmem>>, %arg7: memref<256x128xf32, #tpu.memory_space<vmem>>) attributes {dimension_semantics = [#tpu.dimension_semantics<parallel>, #tpu.dimension_semantics<parallel>, #tpu.dimension_semantics<arbitrary>], iteration_bounds = array<i64: 2, 1, 1>, scalar_prefetch = 0 : i64, scratch_operands = 1 : i64, tpu.core_type = #tpu.core_type<tc>, window_params = [{transform_indices = @transform_0, window_bounds = array<i64: 256, 128>}, {transform_indices = @transform_1, window_bounds = array<i64: 128, 128>}, {transform_indices = @transform_2, window_bounds = array<i64: 1, 128>}, {transform_indices = @transform_3, window_bounds = array<i64: 256, 128>}]} {
    %c0_i32 = arith.constant 0 : i32
    %0 = arith.cmpi eq, %arg2, %c0_i32 : i32
    %1 = arith.extui %0 : i1 to i32
    %c0_i32_0 = arith.constant 0 : i32
    %2 = arith.cmpi ne, %1, %c0_i32_0 : i32
    scf.if %2 {
      %cst_10 = arith.constant 0.000000e+00 : f32
      %12 = vector.broadcast %cst_10 : f32 to vector<256x128xf32>
      %c0_11 = arith.constant 0 : index
      %c0_12 = arith.constant 0 : index
      %13 = vector.load %arg7[%c0_11, %c0_12] : memref<256x128xf32, #tpu.memory_space<vmem>>, vector<256x128xf32>
      tpu.vector_store %arg7[%c0_11, %c0_12], %12 {strides = array<i32>} : memref<256x128xf32, #tpu.memory_space<vmem>>, vector<256x128xf32>,
    } else {
    }
    %c0 = arith.constant 0 : index
    %c0_1 = arith.constant 0 : index
    %3 = vector.load %arg7[%c0, %c0_1] : memref<256x128xf32, #tpu.memory_space<vmem>>, vector<256x128xf32>
    %c0_2 = arith.constant 0 : index
    %c0_3 = arith.constant 0 : index
    %4 = vector.load %arg3[%c0_2, %c0_3] : memref<256x128xf32, #tpu.memory_space<vmem>>, vector<256x128xf32>
    %c0_4 = arith.constant 0 : index
    %c0_5 = arith.constant 0 : index
    %5 = vector.load %arg4[%c0_4, %c0_5] : memref<128x128xf32, #tpu.memory_space<vmem>>, vector<128x128xf32>
    %cst = arith.constant dense<0.000000e+00> : vector<256x128xf32>
    %6 = tpu.matmul %4, %5, %cst {dimension_numbers = #tpu.dot_dimension_numbers<[1], [1], [0], [0], [0, 0, 1, 0], [], []>} : vector<256x128xf32>, vector<128x128xf32>, vector<256x128xf32> -> vector<256x128xf32>
    %7 = arith.addf %3, %6 : vector<256x128xf32>
    %c0_6 = arith.constant 0 : index
    %c0_7 = arith.constant 0 : index
    %8 = vector.load %arg7[%c0_6, %c0_7] : memref<256x128xf32, #tpu.memory_space<vmem>>, vector<256x128xf32>
    tpu.vector_store %arg7[%c0_6, %c0_7], %7 {strides = array<i32>} : memref<256x128xf32, #tpu.memory_space<vmem>>, vector<256x128xf32>,
    %c0_i32_8 = arith.constant 0 : i32
    %9 = arith.cmpi eq, %arg2, %c0_i32_8 : i32
    %10 = arith.extui %9 : i1 to i32
    %c0_i32_9 = arith.constant 0 : i32
    %11 = arith.cmpi ne, %10, %c0_i32_9 : i32
    scf.if %11 {
      %c0_10 = arith.constant 0 : index
      %c0_11 = arith.constant 0 : index
      %12 = vector.load %arg7[%c0_10, %c0_11] : memref<256x128xf32, #tpu.memory_space<vmem>>, vector<256x128xf32>
      %c0_12 = arith.constant 0 : index
      %c0_13 = arith.constant 0 : index
      %13 = vector.load %arg5[%c0_12, %c0_13] : memref<1x128xf32, #tpu.memory_space<vmem>>, vector<1x128xf32>
      %14 = vector.broadcast %13 : vector<1x128xf32> to vector<256x128xf32>
      %15 = arith.addf %12, %14 : vector<256x128xf32>
      %cst_14 = arith.constant 0.000000e+00 : f32
      %16 = vector.broadcast %cst_14 : f32 to vector<256x128xf32>
      %17 = arith.maximumf %15, %16 : vector<256x128xf32>
      %c0_15 = arith.constant 0 : index
      %c0_16 = arith.constant 0 : index
      %18 = vector.load %arg6[%c0_15, %c0_16] : memref<256x128xf32, #tpu.memory_space<vmem>>, vector<256x128xf32>
      tpu.vector_store %arg6[%c0_15, %c0_16], %17 {strides = array<i32>} : memref<256x128xf32, #tpu.memory_space<vmem>>, vector<256x128xf32>,
    } else {
    }
    return
  }
  func.func @transform_0(%arg0: i32, %arg1: i32, %arg2: i32) -> (i32, i32) {
    %c0_i32 = arith.constant 0 : i32
    return %arg0, %arg2 : i32, i32
  }
  func.func @transform_1(%arg0: i32, %arg1: i32, %arg2: i32) -> (i32, i32) {
    %c0_i32 = arith.constant 0 : i32
    return %arg1, %arg2 : i32, i32
  }
  func.func @transform_2(%arg0: i32, %arg1: i32, %arg2: i32) -> (i32, i32) {
    %c0_i32 = arith.constant 0 : i32
    %c0_i32_0 = arith.constant 0 : i32
    return %c0_i32, %arg1 : i32, i32
  }
  func.func @transform_3(%arg0: i32, %arg1: i32, %arg2: i32) -> (i32, i32) {
    %c0_i32 = arith.constant 0 : i32
    return %arg0, %arg1 : i32, i32
  }
}

module attributes {stable_mosaic.version = 11 : i64} {
  func.func @_matmul_bias_kernel(%arg0: i32, %arg1: i32, %arg2: i32, %arg3: memref<64x256xf32, #tpu.memory_space<vmem>>, %arg4: memref<128x256xf32, #tpu.memory_space<vmem>>, %arg5: memref<1x128xf32, #tpu.memory_space<vmem>>, %arg6: memref<64x128xf32, #tpu.memory_space<vmem>>, %arg7: memref<64x128xf32, #tpu.memory_space<vmem>>) attributes {dimension_semantics = [#tpu.dimension_semantics<parallel>, #tpu.dimension_semantics<parallel>, #tpu.dimension_semantics<arbitrary>], iteration_bounds = array<i64: 2, 1, 1>, scalar_prefetch = 0 : i64, scratch_operands = 1 : i64, tpu.core_type = #tpu.core_type<tc>, window_params = [{transform_indices = @transform_0, window_bounds = array<i64: 64, 256>}, {transform_indices = @transform_1, window_bounds = array<i64: 128, 256>}, {transform_indices = @transform_2, window_bounds = array<i64: 1, 128>}, {transform_indices = @transform_3, window_bounds = array<i64: 64, 128>}]} {
    %c0_i32 = arith.constant 0 : i32
    %0 = arith.cmpi eq, %arg2, %c0_i32 : i32
    %1 = arith.extui %0 : i1 to i32
    %c0_i32_0 = arith.constant 0 : i32
    %2 = arith.cmpi ne, %1, %c0_i32_0 : i32
    scf.if %2 {
      %cst_10 = arith.constant 0.000000e+00 : f32
      %12 = vector.broadcast %cst_10 : f32 to vector<64x128xf32>
      %c0_11 = arith.constant 0 : index
      %c0_12 = arith.constant 0 : index
      %13 = vector.load %arg7[%c0_11, %c0_12] : memref<64x128xf32, #tpu.memory_space<vmem>>, vector<64x128xf32>
      tpu.vector_store %arg7[%c0_11, %c0_12], %12 {strides = array<i32>} : memref<64x128xf32, #tpu.memory_space<vmem>>, vector<64x128xf32>,
    } else {
    }
    %c0 = arith.constant 0 : index
    %c0_1 = arith.constant 0 : index
    %3 = vector.load %arg7[%c0, %c0_1] : memref<64x128xf32, #tpu.memory_space<vmem>>, vector<64x128xf32>
    %c0_2 = arith.constant 0 : index
    %c0_3 = arith.constant 0 : index
    %4 = vector.load %arg3[%c0_2, %c0_3] : memref<64x256xf32, #tpu.memory_space<vmem>>, vector<64x256xf32>
    %c0_4 = arith.constant 0 : index
    %c0_5 = arith.constant 0 : index
    %5 = vector.load %arg4[%c0_4, %c0_5] : memref<128x256xf32, #tpu.memory_space<vmem>>, vector<128x256xf32>
    %cst = arith.constant dense<0.000000e+00> : vector<64x128xf32>
    %6 = tpu.matmul %4, %5, %cst {dimension_numbers = #tpu.dot_dimension_numbers<[1], [1], [0], [0], [0, 0, 1, 0], [], []>} : vector<64x256xf32>, vector<128x256xf32>, vector<64x128xf32> -> vector<64x128xf32>
    %7 = arith.addf %3, %6 : vector<64x128xf32>
    %c0_6 = arith.constant 0 : index
    %c0_7 = arith.constant 0 : index
    %8 = vector.load %arg7[%c0_6, %c0_7] : memref<64x128xf32, #tpu.memory_space<vmem>>, vector<64x128xf32>
    tpu.vector_store %arg7[%c0_6, %c0_7], %7 {strides = array<i32>} : memref<64x128xf32, #tpu.memory_space<vmem>>, vector<64x128xf32>,
    %c0_i32_8 = arith.constant 0 : i32
    %9 = arith.cmpi eq, %arg2, %c0_i32_8 : i32
    %10 = arith.extui %9 : i1 to i32
    %c0_i32_9 = arith.constant 0 : i32
    %11 = arith.cmpi ne, %10, %c0_i32_9 : i32
    scf.if %11 {
      %c0_10 = arith.constant 0 : index
      %c0_11 = arith.constant 0 : index
      %12 = vector.load %arg7[%c0_10, %c0_11] : memref<64x128xf32, #tpu.memory_space<vmem>>, vector<64x128xf32>
      %c0_12 = arith.constant 0 : index
      %c0_13 = arith.constant 0 : index
      %13 = vector.load %arg5[%c0_12, %c0_13] : memref<1x128xf32, #tpu.memory_space<vmem>>, vector<1x128xf32>
      %14 = vector.broadcast %13 : vector<1x128xf32> to vector<64x128xf32>
      %15 = arith.addf %12, %14 : vector<64x128xf32>
      %cst_14 = arith.constant 0.000000e+00 : f32
      %16 = vector.broadcast %cst_14 : f32 to vector<64x128xf32>
      %17 = arith.maximumf %15, %16 : vector<64x128xf32>
      %c0_15 = arith.constant 0 : index
      %c0_16 = arith.constant 0 : index
      %18 = vector.load %arg6[%c0_15, %c0_16] : memref<64x128xf32, #tpu.memory_space<vmem>>, vector<64x128xf32>
      tpu.vector_store %arg6[%c0_15, %c0_16], %17 {strides = array<i32>} : memref<64x128xf32, #tpu.memory_space<vmem>>, vector<64x128xf32>,
    } else {
    }
    return
  }
  func.func @transform_0(%arg0: i32, %arg1: i32, %arg2: i32) -> (i32, i32) {
    %c0_i32 = arith.constant 0 : i32
    return %arg0, %arg2 : i32, i32
  }
  func.func @transform_1(%arg0: i32, %arg1: i32, %arg2: i32) -> (i32, i32) {
    %c0_i32 = arith.constant 0 : i32
    return %arg1, %arg2 : i32, i32
  }
  func.func @transform_2(%arg0: i32, %arg1: i32, %arg2: i32) -> (i32, i32) {
    %c0_i32 = arith.constant 0 : i32
    %c0_i32_0 = arith.constant 0 : i32
    return %c0_i32, %arg1 : i32, i32
  }
  func.func @transform_3(%arg0: i32, %arg1: i32, %arg2: i32) -> (i32, i32) {
    %c0_i32 = arith.constant 0 : i32
    return %arg0, %arg1 : i32, i32
  }
}

module attributes {stable_mosaic.version = 11 : i64} {
  func.func @_matmul_bias_kernel(%arg0: i32, %arg1: i32, %arg2: i32, %arg3: memref<8x512xf32, #tpu.memory_space<vmem>>, %arg4: memref<128x512xf32, #tpu.memory_space<vmem>>, %arg5: memref<1x128xf32, #tpu.memory_space<vmem>>, %arg6: memref<8x128xf32, #tpu.memory_space<vmem>>, %arg7: memref<8x128xf32, #tpu.memory_space<vmem>>) attributes {dimension_semantics = [#tpu.dimension_semantics<parallel>, #tpu.dimension_semantics<parallel>, #tpu.dimension_semantics<arbitrary>], iteration_bounds = array<i64: 1, 1, 1>, scalar_prefetch = 0 : i64, scratch_operands = 1 : i64, tpu.core_type = #tpu.core_type<tc>, window_params = [{transform_indices = @transform_0, window_bounds = array<i64: 8, 512>}, {transform_indices = @transform_1, window_bounds = array<i64: 128, 512>}, {transform_indices = @transform_2, window_bounds = array<i64: 1, 128>}, {transform_indices = @transform_3, window_bounds = array<i64: 8, 128>}]} {
    %c0_i32 = arith.constant 0 : i32
    %0 = arith.cmpi eq, %arg2, %c0_i32 : i32
    %1 = arith.extui %0 : i1 to i32
    %c0_i32_0 = arith.constant 0 : i32
    %2 = arith.cmpi ne, %1, %c0_i32_0 : i32
    scf.if %2 {
      %cst_10 = arith.constant 0.000000e+00 : f32
      %12 = vector.broadcast %cst_10 : f32 to vector<8x128xf32>
      %c0_11 = arith.constant 0 : index
      %c0_12 = arith.constant 0 : index
      %13 = vector.load %arg7[%c0_11, %c0_12] : memref<8x128xf32, #tpu.memory_space<vmem>>, vector<8x128xf32>
      tpu.vector_store %arg7[%c0_11, %c0_12], %12 {strides = array<i32>} : memref<8x128xf32, #tpu.memory_space<vmem>>, vector<8x128xf32>,
    } else {
    }
    %c0 = arith.constant 0 : index
    %c0_1 = arith.constant 0 : index
    %3 = vector.load %arg7[%c0, %c0_1] : memref<8x128xf32, #tpu.memory_space<vmem>>, vector<8x128xf32>
    %c0_2 = arith.constant 0 : index
    %c0_3 = arith.constant 0 : index
    %4 = vector.load %arg3[%c0_2, %c0_3] : memref<8x512xf32, #tpu.memory_space<vmem>>, vector<8x512xf32>
    %c0_4 = arith.constant 0 : index
    %c0_5 = arith.constant 0 : index
    %5 = vector.load %arg4[%c0_4, %c0_5] : memref<128x512xf32, #tpu.memory_space<vmem>>, vector<128x512xf32>
    %cst = arith.constant dense<0.000000e+00> : vector<8x128xf32>
    %6 = tpu.matmul %4, %5, %cst {dimension_numbers = #tpu.dot_dimension_numbers<[1], [1], [0], [0], [0, 0, 1, 0], [], []>} : vector<8x512xf32>, vector<128x512xf32>, vector<8x128xf32> -> vector<8x128xf32>
    %7 = arith.addf %3, %6 : vector<8x128xf32>
    %c0_6 = arith.constant 0 : index
    %c0_7 = arith.constant 0 : index
    %8 = vector.load %arg7[%c0_6, %c0_7] : memref<8x128xf32, #tpu.memory_space<vmem>>, vector<8x128xf32>
    tpu.vector_store %arg7[%c0_6, %c0_7], %7 {strides = array<i32>} : memref<8x128xf32, #tpu.memory_space<vmem>>, vector<8x128xf32>,
    %c0_i32_8 = arith.constant 0 : i32
    %9 = arith.cmpi eq, %arg2, %c0_i32_8 : i32
    %10 = arith.extui %9 : i1 to i32
    %c0_i32_9 = arith.constant 0 : i32
    %11 = arith.cmpi ne, %10, %c0_i32_9 : i32
    scf.if %11 {
      %c0_10 = arith.constant 0 : index
      %c0_11 = arith.constant 0 : index
      %12 = vector.load %arg7[%c0_10, %c0_11] : memref<8x128xf32, #tpu.memory_space<vmem>>, vector<8x128xf32>
      %c0_12 = arith.constant 0 : index
      %c0_13 = arith.constant 0 : index
      %13 = vector.load %arg5[%c0_12, %c0_13] : memref<1x128xf32, #tpu.memory_space<vmem>>, vector<1x128xf32>
      %14 = vector.broadcast %13 : vector<1x128xf32> to vector<8x128xf32>
      %15 = arith.addf %12, %14 : vector<8x128xf32>
      %cst_14 = arith.constant 0.000000e+00 : f32
      %16 = vector.broadcast %cst_14 : f32 to vector<8x128xf32>
      %17 = arith.maximumf %15, %16 : vector<8x128xf32>
      %c0_15 = arith.constant 0 : index
      %c0_16 = arith.constant 0 : index
      %18 = vector.load %arg6[%c0_15, %c0_16] : memref<8x128xf32, #tpu.memory_space<vmem>>, vector<8x128xf32>
      tpu.vector_store %arg6[%c0_15, %c0_16], %17 {strides = array<i32>} : memref<8x128xf32, #tpu.memory_space<vmem>>, vector<8x128xf32>,
    } else {
    }
    return
  }
  func.func @transform_0(%arg0: i32, %arg1: i32, %arg2: i32) -> (i32, i32) {
    %c0_i32 = arith.constant 0 : i32
    return %arg0, %arg2 : i32, i32
  }
  func.func @transform_1(%arg0: i32, %arg1: i32, %arg2: i32) -> (i32, i32) {
    %c0_i32 = arith.constant 0 : i32
    return %arg1, %arg2 : i32, i32
  }
  func.func @transform_2(%arg0: i32, %arg1: i32, %arg2: i32) -> (i32, i32) {
    %c0_i32 = arith.constant 0 : i32
    %c0_i32_0 = arith.constant 0 : i32
    return %c0_i32, %arg1 : i32, i32
  }
  func.func @transform_3(%arg0: i32, %arg1: i32, %arg2: i32) -> (i32, i32) {
    %c0_i32 = arith.constant 0 : i32
    return %arg0, %arg1 : i32, i32
  }
}

module attributes {stable_mosaic.version = 11 : i64} {
  func.func @_matmul_bias_kernel(%arg0: i32, %arg1: i32, %arg2: i32, %arg3: memref<8x128xf32, #tpu.memory_space<vmem>>, %arg4: memref<128x128xf32, #tpu.memory_space<vmem>>, %arg5: memref<1x128xf32, #tpu.memory_space<vmem>>, %arg6: memref<8x128xf32, #tpu.memory_space<vmem>>, %arg7: memref<8x128xf32, #tpu.memory_space<vmem>>) attributes {dimension_semantics = [#tpu.dimension_semantics<parallel>, #tpu.dimension_semantics<parallel>, #tpu.dimension_semantics<arbitrary>], iteration_bounds = array<i64: 1, 1, 1>, scalar_prefetch = 0 : i64, scratch_operands = 1 : i64, tpu.core_type = #tpu.core_type<tc>, window_params = [{transform_indices = @transform_0, window_bounds = array<i64: 8, 128>}, {transform_indices = @transform_1, window_bounds = array<i64: 128, 128>}, {transform_indices = @transform_2, window_bounds = array<i64: 1, 128>}, {transform_indices = @transform_3, window_bounds = array<i64: 8, 128>}]} {
    %c0_i32 = arith.constant 0 : i32
    %0 = arith.cmpi eq, %arg2, %c0_i32 : i32
    %1 = arith.extui %0 : i1 to i32
    %c0_i32_0 = arith.constant 0 : i32
    %2 = arith.cmpi ne, %1, %c0_i32_0 : i32
    scf.if %2 {
      %cst_10 = arith.constant 0.000000e+00 : f32
      %12 = vector.broadcast %cst_10 : f32 to vector<8x128xf32>
      %c0_11 = arith.constant 0 : index
      %c0_12 = arith.constant 0 : index
      %13 = vector.load %arg7[%c0_11, %c0_12] : memref<8x128xf32, #tpu.memory_space<vmem>>, vector<8x128xf32>
      tpu.vector_store %arg7[%c0_11, %c0_12], %12 {strides = array<i32>} : memref<8x128xf32, #tpu.memory_space<vmem>>, vector<8x128xf32>,
    } else {
    }
    %c0 = arith.constant 0 : index
    %c0_1 = arith.constant 0 : index
    %3 = vector.load %arg7[%c0, %c0_1] : memref<8x128xf32, #tpu.memory_space<vmem>>, vector<8x128xf32>
    %c0_2 = arith.constant 0 : index
    %c0_3 = arith.constant 0 : index
    %4 = vector.load %arg3[%c0_2, %c0_3] : memref<8x128xf32, #tpu.memory_space<vmem>>, vector<8x128xf32>
    %c0_4 = arith.constant 0 : index
    %c0_5 = arith.constant 0 : index
    %5 = vector.load %arg4[%c0_4, %c0_5] : memref<128x128xf32, #tpu.memory_space<vmem>>, vector<128x128xf32>
    %cst = arith.constant dense<0.000000e+00> : vector<8x128xf32>
    %6 = tpu.matmul %4, %5, %cst {dimension_numbers = #tpu.dot_dimension_numbers<[1], [1], [0], [0], [0, 0, 1, 0], [], []>} : vector<8x128xf32>, vector<128x128xf32>, vector<8x128xf32> -> vector<8x128xf32>
    %7 = arith.addf %3, %6 : vector<8x128xf32>
    %c0_6 = arith.constant 0 : index
    %c0_7 = arith.constant 0 : index
    %8 = vector.load %arg7[%c0_6, %c0_7] : memref<8x128xf32, #tpu.memory_space<vmem>>, vector<8x128xf32>
    tpu.vector_store %arg7[%c0_6, %c0_7], %7 {strides = array<i32>} : memref<8x128xf32, #tpu.memory_space<vmem>>, vector<8x128xf32>,
    %c0_i32_8 = arith.constant 0 : i32
    %9 = arith.cmpi eq, %arg2, %c0_i32_8 : i32
    %10 = arith.extui %9 : i1 to i32
    %c0_i32_9 = arith.constant 0 : i32
    %11 = arith.cmpi ne, %10, %c0_i32_9 : i32
    scf.if %11 {
      %c0_10 = arith.constant 0 : index
      %c0_11 = arith.constant 0 : index
      %12 = vector.load %arg7[%c0_10, %c0_11] : memref<8x128xf32, #tpu.memory_space<vmem>>, vector<8x128xf32>
      %c0_12 = arith.constant 0 : index
      %c0_13 = arith.constant 0 : index
      %13 = vector.load %arg5[%c0_12, %c0_13] : memref<1x128xf32, #tpu.memory_space<vmem>>, vector<1x128xf32>
      %14 = vector.broadcast %13 : vector<1x128xf32> to vector<8x128xf32>
      %15 = arith.addf %12, %14 : vector<8x128xf32>
      %c0_14 = arith.constant 0 : index
      %c0_15 = arith.constant 0 : index
      %16 = vector.load %arg6[%c0_14, %c0_15] : memref<8x128xf32, #tpu.memory_space<vmem>>, vector<8x128xf32>
      tpu.vector_store %arg6[%c0_14, %c0_15], %15 {strides = array<i32>} : memref<8x128xf32, #tpu.memory_space<vmem>>, vector<8x128xf32>,
    } else {
    }
    return
  }
  func.func @transform_0(%arg0: i32, %arg1: i32, %arg2: i32) -> (i32, i32) {
    %c0_i32 = arith.constant 0 : i32
    return %arg0, %arg2 : i32, i32
  }
  func.func @transform_1(%arg0: i32, %arg1: i32, %arg2: i32) -> (i32, i32) {
    %c0_i32 = arith.constant 0 : i32
    return %arg1, %arg2 : i32, i32
  }
  func.func @transform_2(%arg0: i32, %arg1: i32, %arg2: i32) -> (i32, i32) {
    %c0_i32 = arith.constant 0 : i32
    %c0_i32_0 = arith.constant 0 : i32
    return %c0_i32, %arg1 : i32, i32
  }
  func.func @transform_3(%arg0: i32, %arg1: i32, %arg2: i32) -> (i32, i32) {
    %c0_i32 = arith.constant 0 : i32
    return %arg0, %arg1 : i32, i32
  }
}

</mosaic_0001>

<bundles_post_ra>
// kernel: vgg_forward.4
= control target key start
LH: loop header
LB: loop body
LE: loop exit
PB: predicated region body
PF: predicated region fallthrough
CT: control target
= control target key end

     0   :  { %s928_s12 = smov 0   ;;  %s930_s13 = smov 0   ;;  %s1124_s0 = inlined_call_operand.vmem [shape: f32[512,128], index: 0, kind: input, shape index: {}]   ;;  %s1125_s1 = inlined_call_operand.vmem [shape: f32[128,128], index: 1, kind: input, shape index: {}]   ;;  %s1126_s2 = inlined_call_operand.vmem [shape: f32[1,128], index: 2, kind: input, shape index: {}]   ;;  %s1127_s3 = inlined_call_operand.vmem [shape: f32[512,128], index: 3, kind: output, shape index: {}]  }
   0x1   :  { %s932_s14 = smov 0  }
   0x2 LB: > { %s32_s15 = sadd.s32 1, %s902_s13  ;;  %p804_p0 = scmp.ge.s32.totalorder %s906_s14, 1  ;;  %s906_s14 = sphi %s932_s14, %s13_s14   ;;  %s902_s13 = sphi %s930_s13, %s1129_s13   ;;  %s898_s12 = sphi %s928_s12, %s1128_s12  }
   0x3   : > { %p34_p1 = scmp.ge.s32.totalorder %s32_s15, 2  ;;  %p188_p2 = scmp.lt.s32.totalorder %s906_s14, 3 }
   0x5   : > { %s1131_s15 = smov (%p34_p1, %s32_s15), 0  ;;  %p189_p3 = pnand %p804_p0, %p188_p2 }
   0x6   : > { %s805_s17 = sshll.u32 (!%p189_p3), %s898_s12, 5 }
   0x7   : > { %192 = sbr.rel (%p189_p3) target bundleno = 270 (0x10e), region = 32  ;;  %p230_p4 = scmp.lt.s32.totalorder (!%p189_p3), %s805_s17, 63 }
   0xc   : > { %v374_v0 = vld [vmem:[%s1125_s1 + $0x78] sm:$0xff]  ;;  %v373_v1 = vld [vmem:[%s1125_s1 + $0x70] sm:$0xff]  ;;  %v372_v2 = vld [vmem:[%s1125_s1 + $0x68] sm:$0xff]  ;;  %s1133_s17 = smov (!%p230_p4, %s805_s17), 63 }
   0xd   : > { %812 = vmatpush.xpose.msra.mxu2 %v374_v0  ;;  %813 = vmatpush.xpose.msra.mxu3 %v374_v0  ;;  %v371_v3 = vld [vmem:[%s1125_s1 + $0x60] sm:$0xff]  ;;  %v370_v4 = vld [vmem:[%s1125_s1 + $0x58] sm:$0xff]  ;;  %v369_v5 = vld [vmem:[%s1125_s1 + $0x50] sm:$0xff]  ;;  %s806_s23 = sshll.u32 %s1133_s17, 3 }
   0xe   : > { %375 = vmatpush.xpose.msra.mxu0 %v374_v0  ;;  %811 = vmatpush.xpose.msra.mxu1 %v374_v0  ;;  %v368_v6 = vld [vmem:[%s1125_s1 + $0x48] sm:$0xff]  ;;  %v367_v7 = vld [vmem:[%s1125_s1 + $0x40] sm:$0xff]  ;;  %v366_v8 = vld [vmem:[%s1125_s1 + $0x38] sm:$0xff]  ;;  %s1005_s28 = scalar_lea.vmem %s1124_s0, %s806_s23  ;;  %s1051_s6 = scalar_lea.vmem %s1127_s3, %s806_s23 }
   0xf   : > { %v365_v9 = vld [vmem:[%s1125_s1 + $0x30] sm:$0xff]  ;;  %v364_v10 = vld [vmem:[%s1125_s1 + $0x28] sm:$0xff]  ;;  %v363_v11 = vld [vmem:[%s1125_s1 + $0x20] sm:$0xff] }
  0x10   : > { %v362_v12 = vld [vmem:[%s1125_s1 + $0x18] sm:$0xff]  ;;  %v361_v13 = vld [vmem:[%s1125_s1 + $0x10] sm:$0xff]  ;;  %v360_v14 = vld [vmem:[%s1125_s1 + $0x8] sm:$0xff] }
  0x11   : > { %815 = vmatpush.xpose.msra.mxu2 %v373_v1  ;;  %816 = vmatpush.xpose.msra.mxu3 %v373_v1  ;;  %v359_v15 = vld [vmem:[%s1125_s1] sm:$0xff]  ;;  %v344_v20 = vld [vmem:[%s1005_s28 + $0x88] sm:$0xff]  ;;  %v345_v24 = vld [vmem:[%s1005_s28 + $0x90] sm:$0xff] }
  0x12   : > { %376 = vmatpush.xpose.msra.mxu0 %v373_v1  ;;  %814 = vmatpush.xpose.msra.mxu1 %v373_v1  ;;  %v343_v16 = vld [vmem:[%s1005_s28 + $0x80] sm:$0xff]  ;;  %v352_v21 = vld [vmem:[%s1005_s28 + $0xc8] sm:$0xff]  ;;  %v353_v25 = vld [vmem:[%s1005_s28 + $0xd0] sm:$0xff] }
  0x13   : > { %v351_v17 = vld [vmem:[%s1005_s28 + $0xc0] sm:$0xff]  ;;  %v328_v22 = vld [vmem:[%s1005_s28 + $0x8] sm:$0xff]  ;;  %v329_v26 = vld [vmem:[%s1005_s28 + $0x10] sm:$0xff] }
  0x14   : > { %v327_v18 = vld [vmem:[%s1005_s28] sm:$0xff]  ;;  %v336_v23 = vld [vmem:[%s1005_s28 + $0x48] sm:$0xff]  ;;  %v337_v27 = vld [vmem:[%s1005_s28 + $0x50] sm:$0xff] }
  0x15   : > { %818 = vmatpush.xpose.msra.mxu2 %v372_v2  ;;  %819 = vmatpush.xpose.msra.mxu3 %v372_v2  ;;  %v335_v19 = vld [vmem:[%s1005_s28 + $0x40] sm:$0xff]  ;;  %v346_v28 = vld [vmem:[%s1005_s28 + $0x98] sm:$0xff]  ;;  %v348_v36 = vld [vmem:[%s1005_s28 + $0xa8] sm:$0xff] }
  0x16   : > { %377 = vmatpush.xpose.msra.mxu0 %v372_v2  ;;  %817 = vmatpush.xpose.msra.mxu1 %v372_v2  ;;  %v354_v29 = vld [vmem:[%s1005_s28 + $0xd8] sm:$0xff]  ;;  %v347_v32 = vld [vmem:[%s1005_s28 + $0xa0] sm:$0xff]  ;;  %v356_v37 = vld [vmem:[%s1005_s28 + $0xe8] sm:$0xff] }
  0x17   : > { %v330_v30 = vld [vmem:[%s1005_s28 + $0x18] sm:$0xff]  ;;  %v355_v33 = vld [vmem:[%s1005_s28 + $0xe0] sm:$0xff]  ;;  %v332_v38 = vld [vmem:[%s1005_s28 + $0x28] sm:$0xff] }
  0x18   : > { %v338_v31 = vld [vmem:[%s1005_s28 + $0x58] sm:$0xff]  ;;  %v331_v34 = vld [vmem:[%s1005_s28 + $0x20] sm:$0xff]  ;;  %v340_v39 = vld [vmem:[%s1005_s28 + $0x68] sm:$0xff] }
  0x19   : > { %821 = vmatpush.xpose.msra.mxu2 %v371_v3  ;;  %822 = vmatpush.xpose.msra.mxu3 %v371_v3  ;;  %v339_v35 = vld [vmem:[%s1005_s28 + $0x60] sm:$0xff]  ;;  %v349_v40 = vld [vmem:[%s1005_s28 + $0xb0] sm:$0xff]  ;;  %v350_v44 = vld [vmem:[%s1005_s28 + $0xb8] sm:$0xff] }
  0x1a   : > { %378 = vmatpush.xpose.msra.mxu0 %v371_v3  ;;  %820 = vmatpush.xpose.msra.mxu1 %v371_v3  ;;  %v357_v41 = vld [vmem:[%s1005_s28 + $0xf0] sm:$0xff]  ;;  %v358_v45 = vld [vmem:[%s1005_s28 + $0xf8] sm:$0xff]  ;;  %v1042_v48 = vld [vmem:[%s1126_s2] ss:$0 sm:$0xff] }
  0x1b   : > { %v333_v42 = vld [vmem:[%s1005_s28 + $0x30] sm:$0xff]  ;;  %v334_v46 = vld [vmem:[%s1005_s28 + $0x38] sm:$0xff] }
  0x1c   : > { %v341_v43 = vld [vmem:[%s1005_s28 + $0x70] sm:$0xff]  ;;  %v342_v47 = vld [vmem:[%s1005_s28 + $0x78] sm:$0xff] }
  0x1d   : > { %824 = vmatpush.xpose.msra.mxu2 %v370_v4  ;;  %825 = vmatpush.xpose.msra.mxu3 %v370_v4 }
  0x1e   : > { %379 = vmatpush.xpose.msra.mxu0 %v370_v4  ;;  %823 = vmatpush.xpose.msra.mxu1 %v370_v4 }
  0x21   : > { %827 = vmatpush.xpose.msra.mxu2 %v369_v5  ;;  %828 = vmatpush.xpose.msra.mxu3 %v369_v5 }
  0x22   : > { %380 = vmatpush.xpose.msra.mxu0 %v369_v5  ;;  %826 = vmatpush.xpose.msra.mxu1 %v369_v5 }
  0x25   : > { %830 = vmatpush.xpose.msra.mxu2 %v368_v6  ;;  %831 = vmatpush.xpose.msra.mxu3 %v368_v6 }
  0x26   : > { %381 = vmatpush.xpose.msra.mxu0 %v368_v6  ;;  %829 = vmatpush.xpose.msra.mxu1 %v368_v6 }
  0x29   : > { %833 = vmatpush.xpose.msra.mxu2 %v367_v7  ;;  %834 = vmatpush.xpose.msra.mxu3 %v367_v7 }
  0x2a   : > { %382 = vmatpush.xpose.msra.mxu0 %v367_v7  ;;  %832 = vmatpush.xpose.msra.mxu1 %v367_v7 }
  0x2d   : > { %836 = vmatpush.xpose.msra.mxu2 %v366_v8  ;;  %837 = vmatpush.xpose.msra.mxu3 %v366_v8 }
  0x2e   : > { %383 = vmatpush.xpose.msra.mxu0 %v366_v8  ;;  %835 = vmatpush.xpose.msra.mxu1 %v366_v8 }
  0x31   : > { %839 = vmatpush.xpose.msra.mxu2 %v365_v9  ;;  %840 = vmatpush.xpose.msra.mxu3 %v365_v9 }
  0x32   : > { %384 = vmatpush.xpose.msra.mxu0 %v365_v9  ;;  %838 = vmatpush.xpose.msra.mxu1 %v365_v9 }
  0x35   : > { %842 = vmatpush.xpose.msra.mxu2 %v364_v10  ;;  %843 = vmatpush.xpose.msra.mxu3 %v364_v10 }
  0x36   : > { %385 = vmatpush.xpose.msra.mxu0 %v364_v10  ;;  %841 = vmatpush.xpose.msra.mxu1 %v364_v10 }
  0x39   : > { %845 = vmatpush.xpose.msra.mxu2 %v363_v11  ;;  %846 = vmatpush.xpose.msra.mxu3 %v363_v11 }
  0x3a   : > { %386 = vmatpush.xpose.msra.mxu0 %v363_v11  ;;  %844 = vmatpush.xpose.msra.mxu1 %v363_v11 }
  0x3d   : > { %848 = vmatpush.xpose.msra.mxu2 %v362_v12  ;;  %849 = vmatpush.xpose.msra.mxu3 %v362_v12 }
  0x3e   : > { %387 = vmatpush.xpose.msra.mxu0 %v362_v12  ;;  %847 = vmatpush.xpose.msra.mxu1 %v362_v12 }
  0x41   : > { %851 = vmatpush.xpose.msra.mxu2 %v361_v13  ;;  %852 = vmatpush.xpose.msra.mxu3 %v361_v13 }
  0x42   : > { %388 = vmatpush.xpose.msra.mxu0 %v361_v13  ;;  %850 = vmatpush.xpose.msra.mxu1 %v361_v13 }
  0x45   : > { %854 = vmatpush.xpose.msra.mxu2 %v360_v14  ;;  %855 = vmatpush.xpose.msra.mxu3 %v360_v14 }
  0x46   : > { %389 = vmatpush.xpose.msra.mxu0 %v360_v14  ;;  %853 = vmatpush.xpose.msra.mxu1 %v360_v14 }
  0x49   : > { %857 = vmatpush.xpose.msra.mxu2 %v359_v15  ;;  %858 = vmatpush.xpose.msra.mxu3 %v359_v15 }
  0x4a   : > { %390 = vmatpush.xpose.msra.mxu0 %v359_v15  ;;  %856 = vmatpush.xpose.msra.mxu1 %v359_v15 }
  0x4c   : > { %439 = vmatmul.f32.vlgmr.msra.gmra.mxu2 %v343_v16  ;;  %463 = vmatmul.f32.vlgmr.msra.gmra.mxu3 %v351_v17 }
  0x4d   : > { %391 = vmatmul.f32.vlgmr.msra.gmra.mxu0 %v327_v18  ;;  %415 = vmatmul.f32.vlgmr.msra.gmra.mxu1 %v335_v19 }
  0x54   : > { %442 = vmatmul.f32.gmra.mxu2 %v344_v20  ;;  %466 = vmatmul.f32.gmra.mxu3 %v352_v21 }
  0x55   : > { %394 = vmatmul.f32.gmra.mxu0 %v328_v22  ;;  %418 = vmatmul.f32.gmra.mxu1 %v336_v23 }
  0x5c   : > { %445 = vmatmul.f32.gmra.mxu2 %v345_v24  ;;  %469 = vmatmul.f32.gmra.mxu3 %v353_v25 }
  0x5d   : > { %397 = vmatmul.f32.gmra.mxu0 %v329_v26  ;;  %421 = vmatmul.f32.gmra.mxu1 %v337_v27 }
  0x64   : > { %448 = vmatmul.f32.gmra.mxu2 %v346_v28  ;;  %472 = vmatmul.f32.gmra.mxu3 %v354_v29 }
  0x65   : > { %400 = vmatmul.f32.gmra.mxu0 %v330_v30  ;;  %424 = vmatmul.f32.gmra.mxu1 %v338_v31 }
  0x6c   : > { %451 = vmatmul.f32.gmra.mxu2 %v347_v32  ;;  %475 = vmatmul.f32.gmra.mxu3 %v355_v33 }
  0x6d   : > { %403 = vmatmul.f32.gmra.mxu0 %v331_v34  ;;  %427 = vmatmul.f32.gmra.mxu1 %v339_v35 }
  0x74   : > { %454 = vmatmul.f32.gmra.mxu2 %v348_v36  ;;  %478 = vmatmul.f32.gmra.mxu3 %v356_v37 }
  0x75   : > { %406 = vmatmul.f32.gmra.mxu0 %v332_v38  ;;  %430 = vmatmul.f32.gmra.mxu1 %v340_v39 }
  0x7c   : > { %457 = vmatmul.f32.gmra.mxu2 %v349_v40  ;;  %481 = vmatmul.f32.gmra.mxu3 %v357_v41 }
  0x7d   : > { %409 = vmatmul.f32.gmra.mxu0 %v333_v42  ;;  %433 = vmatmul.f32.gmra.mxu1 %v341_v43 }
  0x84   : > { %460 = vmatmul.f32.gmra.mxu2 %v350_v44  ;;  %484 = vmatmul.f32.gmra.mxu3 %v358_v45 }
  0x85   : > { %412 = vmatmul.f32.gmra.mxu0 %v334_v46  ;;  %436 = vmatmul.f32.gmra.mxu1 %v342_v47 }
  0xca   : > { %v392_v49 = vpop.f32.mrf.mxu0  ;;  %v416_v50 = vpop.f32.mrf.mxu1 }
  0xcb   : > { %v591_v51 = vadd.f32 %v1042_v48, %v392_v49  ;;  %v599_v52 = vadd.f32 %v1042_v48, %v416_v50 }
  0xcd   : > { %v623_v53 = vmax.f32 %v591_v51, 0.0  ;;  %v631_v54 = vmax.f32 %v599_v52, 0.0 }
  0xcf   : > { %655 = vst [vmem:[%s1051_s6] sm:$0xff] %v623_v53  ;;  %v440_v55 = vpop.f32.mrf.mxu2  ;;  %v464_v56 = vpop.f32.mrf.mxu3 }
  0xd0   : > { %663 = vst [vmem:[%s1051_s6 + $0x40] sm:$0xff] %v631_v54  ;;  %v607_v57 = vadd.f32 %v1042_v48, %v440_v55  ;;  %v615_v58 = vadd.f32 %v1042_v48, %v464_v56 }
  0xd2   : > { %v639_v59 = vmax.f32 %v607_v57, 0.0  ;;  %v647_v60 = vmax.f32 %v615_v58, 0.0  ;;  %v395_v61 = vpop.f32.mrf.mxu0  ;;  %v419_v62 = vpop.f32.mrf.mxu1 }
  0xd3   : > { %v592_v63 = vadd.f32 %v1042_v48, %v395_v61  ;;  %v600_v0 = vadd.f32 %v1042_v48, %v419_v62 }
  0xd4   : > { %671 = vst [vmem:[%s1051_s6 + $0x80] sm:$0xff] %v639_v59 }
  0xd5   : > { %679 = vst [vmem:[%s1051_s6 + $0xc0] sm:$0xff] %v647_v60  ;;  %v624_v1 = vmax.f32 %v592_v63, 0.0  ;;  %v632_v2 = vmax.f32 %v600_v0, 0.0 }
  0xd7   : > { %656 = vst [vmem:[%s1051_s6 + $0x8] sm:$0xff] %v624_v1  ;;  %v443_v3 = vpop.f32.mrf.mxu2  ;;  %v467_v4 = vpop.f32.mrf.mxu3 }
  0xd8   : > { %664 = vst [vmem:[%s1051_s6 + $0x48] sm:$0xff] %v632_v2  ;;  %v608_v5 = vadd.f32 %v1042_v48, %v443_v3  ;;  %v616_v6 = vadd.f32 %v1042_v48, %v467_v4 }
  0xda   : > { %v640_v7 = vmax.f32 %v608_v5, 0.0  ;;  %v648_v8 = vmax.f32 %v616_v6, 0.0  ;;  %v398_v9 = vpop.f32.mrf.mxu0  ;;  %v422_v10 = vpop.f32.mrf.mxu1 }
  0xdb   : > { %v593_v11 = vadd.f32 %v1042_v48, %v398_v9  ;;  %v601_v12 = vadd.f32 %v1042_v48, %v422_v10 }
  0xdc   : > { %672 = vst [vmem:[%s1051_s6 + $0x88] sm:$0xff] %v640_v7 }
  0xdd   : > { %680 = vst [vmem:[%s1051_s6 + $0xc8] sm:$0xff] %v648_v8  ;;  %v625_v13 = vmax.f32 %v593_v11, 0.0  ;;  %v633_v14 = vmax.f32 %v601_v12, 0.0 }
  0xdf   : > { %657 = vst [vmem:[%s1051_s6 + $0x10] sm:$0xff] %v625_v13  ;;  %v446_v15 = vpop.f32.mrf.mxu2  ;;  %v470_v16 = vpop.f32.mrf.mxu3 }
  0xe0   : > { %665 = vst [vmem:[%s1051_s6 + $0x50] sm:$0xff] %v633_v14  ;;  %v609_v17 = vadd.f32 %v1042_v48, %v446_v15  ;;  %v617_v18 = vadd.f32 %v1042_v48, %v470_v16 }
  0xe2   : > { %v641_v19 = vmax.f32 %v609_v17, 0.0  ;;  %v649_v20 = vmax.f32 %v617_v18, 0.0  ;;  %v401_v21 = vpop.f32.mrf.mxu0  ;;  %v425_v22 = vpop.f32.mrf.mxu1 }
  0xe3   : > { %v594_v23 = vadd.f32 %v1042_v48, %v401_v21  ;;  %v602_v24 = vadd.f32 %v1042_v48, %v425_v22 }
  0xe4   : > { %673 = vst [vmem:[%s1051_s6 + $0x90] sm:$0xff] %v641_v19 }
  0xe5   : > { %681 = vst [vmem:[%s1051_s6 + $0xd0] sm:$0xff] %v649_v20  ;;  %v626_v25 = vmax.f32 %v594_v23, 0.0  ;;  %v634_v26 = vmax.f32 %v602_v24, 0.0 }
  0xe7   : > { %658 = vst [vmem:[%s1051_s6 + $0x18] sm:$0xff] %v626_v25  ;;  %v449_v27 = vpop.f32.mrf.mxu2  ;;  %v473_v28 = vpop.f32.mrf.mxu3 }
  0xe8   : > { %666 = vst [vmem:[%s1051_s6 + $0x58] sm:$0xff] %v634_v26  ;;  %v610_v29 = vadd.f32 %v1042_v48, %v449_v27  ;;  %v618_v30 = vadd.f32 %v1042_v48, %v473_v28 }
  0xea   : > { %v642_v31 = vmax.f32 %v610_v29, 0.0  ;;  %v650_v32 = vmax.f32 %v618_v30, 0.0  ;;  %v404_v33 = vpop.f32.mrf.mxu0  ;;  %v428_v34 = vpop.f32.mrf.mxu1 }
  0xeb   : > { %v595_v35 = vadd.f32 %v1042_v48, %v404_v33  ;;  %v603_v36 = vadd.f32 %v1042_v48, %v428_v34 }
  0xec   : > { %674 = vst [vmem:[%s1051_s6 + $0x98] sm:$0xff] %v642_v31 }
  0xed   : > { %682 = vst [vmem:[%s1051_s6 + $0xd8] sm:$0xff] %v650_v32  ;;  %v627_v37 = vmax.f32 %v595_v35, 0.0  ;;  %v635_v38 = vmax.f32 %v603_v36, 0.0 }
  0xef   : > { %659 = vst [vmem:[%s1051_s6 + $0x20] sm:$0xff] %v627_v37  ;;  %v452_v39 = vpop.f32.mrf.mxu2  ;;  %v476_v40 = vpop.f32.mrf.mxu3 }
  0xf0   : > { %667 = vst [vmem:[%s1051_s6 + $0x60] sm:$0xff] %v635_v38  ;;  %v611_v41 = vadd.f32 %v1042_v48, %v452_v39  ;;  %v619_v42 = vadd.f32 %v1042_v48, %v476_v40 }
  0xf2   : > { %v643_v43 = vmax.f32 %v611_v41, 0.0  ;;  %v651_v44 = vmax.f32 %v619_v42, 0.0  ;;  %v407_v45 = vpop.f32.mrf.mxu0  ;;  %v431_v46 = vpop.f32.mrf.mxu1 }
  0xf3   : > { %v596_v47 = vadd.f32 %v1042_v48, %v407_v45  ;;  %v604_v49 = vadd.f32 %v1042_v48, %v431_v46 }
  0xf4   : > { %675 = vst [vmem:[%s1051_s6 + $0xa0] sm:$0xff] %v643_v43 }
  0xf5   : > { %683 = vst [vmem:[%s1051_s6 + $0xe0] sm:$0xff] %v651_v44  ;;  %v628_v50 = vmax.f32 %v596_v47, 0.0  ;;  %v636_v51 = vmax.f32 %v604_v49, 0.0 }
  0xf7   : > { %660 = vst [vmem:[%s1051_s6 + $0x28] sm:$0xff] %v628_v50  ;;  %v455_v52 = vpop.f32.mrf.mxu2  ;;  %v479_v53 = vpop.f32.mrf.mxu3 }
  0xf8   : > { %668 = vst [vmem:[%s1051_s6 + $0x68] sm:$0xff] %v636_v51  ;;  %v612_v54 = vadd.f32 %v1042_v48, %v455_v52  ;;  %v620_v55 = vadd.f32 %v1042_v48, %v479_v53 }
  0xfa   : > { %v644_v56 = vmax.f32 %v612_v54, 0.0  ;;  %v652_v57 = vmax.f32 %v620_v55, 0.0  ;;  %v410_v58 = vpop.f32.mrf.mxu0  ;;  %v434_v59 = vpop.f32.mrf.mxu1 }
  0xfb   : > { %v597_v60 = vadd.f32 %v1042_v48, %v410_v58  ;;  %v605_v61 = vadd.f32 %v1042_v48, %v434_v59 }
  0xfc   : > { %676 = vst [vmem:[%s1051_s6 + $0xa8] sm:$0xff] %v644_v56 }
  0xfd   : > { %684 = vst [vmem:[%s1051_s6 + $0xe8] sm:$0xff] %v652_v57  ;;  %v629_v62 = vmax.f32 %v597_v60, 0.0  ;;  %v637_v63 = vmax.f32 %v605_v61, 0.0 }
  0xff   : > { %661 = vst [vmem:[%s1051_s6 + $0x30] sm:$0xff] %v629_v62  ;;  %v458_v0 = vpop.f32.mrf.mxu2  ;;  %v482_v1 = vpop.f32.mrf.mxu3 }
 0x100   : > { %669 = vst [vmem:[%s1051_s6 + $0x70] sm:$0xff] %v637_v63  ;;  %v613_v2 = vadd.f32 %v1042_v48, %v458_v0  ;;  %v621_v3 = vadd.f32 %v1042_v48, %v482_v1 }
 0x102   : > { %v645_v4 = vmax.f32 %v613_v2, 0.0  ;;  %v653_v5 = vmax.f32 %v621_v3, 0.0  ;;  %v413_v6 = vpop.f32.mrf.mxu0  ;;  %v437_v7 = vpop.f32.mrf.mxu1 }
 0x103   : > { %v598_v8 = vadd.f32 %v1042_v48, %v413_v6  ;;  %v606_v9 = vadd.f32 %v1042_v48, %v437_v7 }
 0x104   : > { %677 = vst [vmem:[%s1051_s6 + $0xb0] sm:$0xff] %v645_v4 }
 0x105   : > { %685 = vst [vmem:[%s1051_s6 + $0xf0] sm:$0xff] %v653_v5  ;;  %v630_v10 = vmax.f32 %v598_v8, 0.0  ;;  %v638_v11 = vmax.f32 %v606_v9, 0.0 }
 0x107   : > { %662 = vst [vmem:[%s1051_s6 + $0x38] sm:$0xff] %v630_v10  ;;  %v461_v12 = vpop.f32.mrf.mxu2  ;;  %v485_v13 = vpop.f32.mrf.mxu3 }
 0x108   : > { %670 = vst [vmem:[%s1051_s6 + $0x78] sm:$0xff] %v638_v11  ;;  %v614_v14 = vadd.f32 %v1042_v48, %v461_v12  ;;  %v622_v15 = vadd.f32 %v1042_v48, %v485_v13 }
 0x10a   : > { %v646_v16 = vmax.f32 %v614_v14, 0.0  ;;  %v654_v17 = vmax.f32 %v622_v15, 0.0 }
 0x10c   : > { %678 = vst [vmem:[%s1051_s6 + $0xb8] sm:$0xff] %v646_v16 }
 0x10d   : > { %686 = vst [vmem:[%s1051_s6 + $0xf8] sm:$0xff] %v654_v17 }
 0x10e PF: > { %s13_s14 = sadd.s32 1, %s906_s14   ;;  %s1128_s12 = smov %s902_s13 }
 0x10f   : > { %p10_p5 = scmp.ge.s32.totalorder %s13_s14, 4   ;;  %s1129_s13 = smov %s1131_s15 }
 0x111   :  { %12 = sbr.rel (!%p10_p5) target bundleno = 2 (0x2), region = 76 }

// kernel: vgg_forward.5
= control target key start
LH: loop header
LB: loop body
LE: loop exit
PB: predicated region body
PF: predicated region fallthrough
CT: control target
= control target key end

     0   :  { %s713_s12 = smov 0   ;;  %s715_s13 = smov 0   ;;  %s880_s0 = inlined_call_operand.vmem [shape: f32[128,256], index: 0, kind: input, shape index: {}]   ;;  %s881_s1 = inlined_call_operand.vmem [shape: f32[128,256], index: 1, kind: input, shape index: {}]   ;;  %s882_s2 = inlined_call_operand.vmem [shape: f32[1,128], index: 2, kind: input, shape index: {}]   ;;  %s883_s3 = inlined_call_operand.vmem [shape: f32[128,128], index: 3, kind: output, shape index: {}]  }
   0x1   :  { %s717_s14 = smov 0  }
   0x2 LB: > { %s32_s15 = sadd.s32 1, %s687_s13  ;;  %p603_p0 = scmp.ge.s32.totalorder %s691_s14, 1  ;;  %s691_s14 = sphi %s717_s14, %s13_s14   ;;  %s687_s13 = sphi %s715_s13, %s885_s13   ;;  %s683_s12 = sphi %s713_s12, %s884_s12  }
   0x3   : > { %p34_p1 = scmp.ge.s32.totalorder %s32_s15, 2  ;;  %p194_p2 = scmp.lt.s32.totalorder %s691_s14, 3 }
   0x5   : > { %s887_s15 = smov (%p34_p1, %s32_s15), 0  ;;  %p195_p3 = pnand %p603_p0, %p194_p2 }
   0x6   : > { %s604_s18 = sshll.u32 (!%p195_p3), %s683_s12, 3 }
   0x7   : > { %198 = sbr.rel (%p195_p3) target bundleno = 239 (0xef), region = 32  ;;  %p241_p4 = scmp.lt.s32.totalorder (!%p195_p3), %s604_s18, 15 }
   0xc   : > { %v341_v0 = vld [vmem:[%s881_s1 + $0xf0] sm:$0xff]  ;;  %v342_v1 = vld [vmem:[%s881_s1 + $0xf8] sm:$0xff]  ;;  %v339_v2 = vld [vmem:[%s881_s1 + $0xe0] sm:$0xff]  ;;  %s889_s18 = smov (!%p241_p4, %s604_s18), 15 }
   0xd   : > { %612 = vmatpush.xpose.msra.mxu2 %v341_v0  ;;  %628 = vmatpush.xpose.msra.mxu3 %v342_v1  ;;  %v340_v3 = vld [vmem:[%s881_s1 + $0xe8] sm:$0xff]  ;;  %v337_v4 = vld [vmem:[%s881_s1 + $0xd0] sm:$0xff]  ;;  %v338_v5 = vld [vmem:[%s881_s1 + $0xd8] sm:$0xff]  ;;  %s611_s30 = sshll.u32 %s889_s18, 4  ;;  %s608_s17 = sshll.u32 %s889_s18, 3 }
   0xe   : > { %343 = vmatpush.xpose.msra.mxu0 %v341_v0  ;;  %384 = vmatpush.xpose.msra.mxu1 %v342_v1  ;;  %v335_v6 = vld [vmem:[%s881_s1 + $0xc0] sm:$0xff]  ;;  %v336_v7 = vld [vmem:[%s881_s1 + $0xc8] sm:$0xff]  ;;  %v333_v8 = vld [vmem:[%s881_s1 + $0xb0] sm:$0xff]  ;;  %s836_s10 = scalar_lea.vmem %s880_s0, %s611_s30  ;;  %s861_s21 = scalar_lea.vmem %s883_s3, %s608_s17 }
   0xf   : > { %v334_v9 = vld [vmem:[%s881_s1 + $0xb8] sm:$0xff]  ;;  %v331_v10 = vld [vmem:[%s881_s1 + $0xa0] sm:$0xff]  ;;  %v332_v11 = vld [vmem:[%s881_s1 + $0xa8] sm:$0xff] }
  0x10   : > { %v329_v12 = vld [vmem:[%s881_s1 + $0x90] sm:$0xff]  ;;  %v330_v13 = vld [vmem:[%s881_s1 + $0x98] sm:$0xff]  ;;  %v327_v14 = vld [vmem:[%s881_s1 + $0x80] sm:$0xff] }
  0x11   : > { %613 = vmatpush.xpose.msra.mxu2 %v339_v2  ;;  %629 = vmatpush.xpose.msra.mxu3 %v340_v3  ;;  %v328_v15 = vld [vmem:[%s881_s1 + $0x88] sm:$0xff]  ;;  %v325_v16 = vld [vmem:[%s881_s1 + $0x70] sm:$0xff]  ;;  %v326_v17 = vld [vmem:[%s881_s1 + $0x78] sm:$0xff] }
  0x12   : > { %344 = vmatpush.xpose.msra.mxu0 %v339_v2  ;;  %385 = vmatpush.xpose.msra.mxu1 %v340_v3  ;;  %v323_v18 = vld [vmem:[%s881_s1 + $0x60] sm:$0xff]  ;;  %v324_v19 = vld [vmem:[%s881_s1 + $0x68] sm:$0xff]  ;;  %v321_v20 = vld [vmem:[%s881_s1 + $0x50] sm:$0xff] }
  0x13   : > { %v322_v21 = vld [vmem:[%s881_s1 + $0x58] sm:$0xff]  ;;  %v319_v22 = vld [vmem:[%s881_s1 + $0x40] sm:$0xff]  ;;  %v320_v23 = vld [vmem:[%s881_s1 + $0x48] sm:$0xff] }
  0x14   : > { %v317_v24 = vld [vmem:[%s881_s1 + $0x30] sm:$0xff]  ;;  %v318_v25 = vld [vmem:[%s881_s1 + $0x38] sm:$0xff]  ;;  %v315_v26 = vld [vmem:[%s881_s1 + $0x20] sm:$0xff] }
  0x15   : > { %614 = vmatpush.xpose.msra.mxu2 %v337_v4  ;;  %630 = vmatpush.xpose.msra.mxu3 %v338_v5  ;;  %v316_v27 = vld [vmem:[%s881_s1 + $0x28] sm:$0xff]  ;;  %v313_v28 = vld [vmem:[%s881_s1 + $0x10] sm:$0xff]  ;;  %v314_v29 = vld [vmem:[%s881_s1 + $0x18] sm:$0xff] }
  0x16   : > { %345 = vmatpush.xpose.msra.mxu0 %v337_v4  ;;  %386 = vmatpush.xpose.msra.mxu1 %v338_v5  ;;  %v311_v30 = vld [vmem:[%s881_s1] sm:$0xff]  ;;  %v312_v31 = vld [vmem:[%s881_s1 + $0x8] sm:$0xff]  ;;  %v305_v36 = vld [vmem:[%s836_s10 + $0x50] sm:$0xff] }
  0x17   : > { %v303_v32 = vld [vmem:[%s836_s10 + $0x40] sm:$0xff]  ;;  %v304_v33 = vld [vmem:[%s836_s10 + $0x48] sm:$0xff]  ;;  %v306_v37 = vld [vmem:[%s836_s10 + $0x58] sm:$0xff] }
  0x18   : > { %v295_v34 = vld [vmem:[%s836_s10] sm:$0xff]  ;;  %v296_v35 = vld [vmem:[%s836_s10 + $0x8] sm:$0xff]  ;;  %v297_v38 = vld [vmem:[%s836_s10 + $0x10] sm:$0xff] }
  0x19   : > { %615 = vmatpush.xpose.msra.mxu2 %v335_v6  ;;  %631 = vmatpush.xpose.msra.mxu3 %v336_v7  ;;  %v298_v39 = vld [vmem:[%s836_s10 + $0x18] sm:$0xff]  ;;  %v307_v40 = vld [vmem:[%s836_s10 + $0x60] sm:$0xff]  ;;  %v308_v41 = vld [vmem:[%s836_s10 + $0x68] sm:$0xff] }
  0x1a   : > { %346 = vmatpush.xpose.msra.mxu0 %v335_v6  ;;  %387 = vmatpush.xpose.msra.mxu1 %v336_v7  ;;  %v299_v42 = vld [vmem:[%s836_s10 + $0x20] sm:$0xff]  ;;  %v300_v43 = vld [vmem:[%s836_s10 + $0x28] sm:$0xff]  ;;  %v309_v44 = vld [vmem:[%s836_s10 + $0x70] sm:$0xff] }
  0x1b   : > { %v310_v45 = vld [vmem:[%s836_s10 + $0x78] sm:$0xff]  ;;  %v301_v46 = vld [vmem:[%s836_s10 + $0x30] sm:$0xff]  ;;  %v668_v48 = vld [vmem:[%s882_s2] ss:$0 sm:$0xff] }
  0x1c   : > { %v302_v47 = vld [vmem:[%s836_s10 + $0x38] sm:$0xff] }
  0x1d   : > { %616 = vmatpush.xpose.msra.mxu2 %v333_v8  ;;  %632 = vmatpush.xpose.msra.mxu3 %v334_v9 }
  0x1e   : > { %347 = vmatpush.xpose.msra.mxu0 %v333_v8  ;;  %388 = vmatpush.xpose.msra.mxu1 %v334_v9 }
  0x21   : > { %617 = vmatpush.xpose.msra.mxu2 %v331_v10  ;;  %633 = vmatpush.xpose.msra.mxu3 %v332_v11 }
  0x22   : > { %348 = vmatpush.xpose.msra.mxu0 %v331_v10  ;;  %389 = vmatpush.xpose.msra.mxu1 %v332_v11 }
  0x25   : > { %618 = vmatpush.xpose.msra.mxu2 %v329_v12  ;;  %634 = vmatpush.xpose.msra.mxu3 %v330_v13 }
  0x26   : > { %349 = vmatpush.xpose.msra.mxu0 %v329_v12  ;;  %390 = vmatpush.xpose.msra.mxu1 %v330_v13 }
  0x29   : > { %619 = vmatpush.xpose.msra.mxu2 %v327_v14  ;;  %635 = vmatpush.xpose.msra.mxu3 %v328_v15 }
  0x2a   : > { %350 = vmatpush.xpose.msra.mxu0 %v327_v14  ;;  %391 = vmatpush.xpose.msra.mxu1 %v328_v15 }
  0x2d   : > { %620 = vmatpush.xpose.msra.mxu2 %v325_v16  ;;  %636 = vmatpush.xpose.msra.mxu3 %v326_v17 }
  0x2e   : > { %351 = vmatpush.xpose.msra.mxu0 %v325_v16  ;;  %392 = vmatpush.xpose.msra.mxu1 %v326_v17 }
  0x31   : > { %621 = vmatpush.xpose.msra.mxu2 %v323_v18  ;;  %637 = vmatpush.xpose.msra.mxu3 %v324_v19 }
  0x32   : > { %352 = vmatpush.xpose.msra.mxu0 %v323_v18  ;;  %393 = vmatpush.xpose.msra.mxu1 %v324_v19 }
  0x35   : > { %622 = vmatpush.xpose.msra.mxu2 %v321_v20  ;;  %638 = vmatpush.xpose.msra.mxu3 %v322_v21 }
  0x36   : > { %353 = vmatpush.xpose.msra.mxu0 %v321_v20  ;;  %394 = vmatpush.xpose.msra.mxu1 %v322_v21 }
  0x39   : > { %623 = vmatpush.xpose.msra.mxu2 %v319_v22  ;;  %639 = vmatpush.xpose.msra.mxu3 %v320_v23 }
  0x3a   : > { %354 = vmatpush.xpose.msra.mxu0 %v319_v22  ;;  %395 = vmatpush.xpose.msra.mxu1 %v320_v23 }
  0x3d   : > { %624 = vmatpush.xpose.msra.mxu2 %v317_v24  ;;  %640 = vmatpush.xpose.msra.mxu3 %v318_v25 }
  0x3e   : > { %355 = vmatpush.xpose.msra.mxu0 %v317_v24  ;;  %396 = vmatpush.xpose.msra.mxu1 %v318_v25 }
  0x41   : > { %625 = vmatpush.xpose.msra.mxu2 %v315_v26  ;;  %641 = vmatpush.xpose.msra.mxu3 %v316_v27 }
  0x42   : > { %356 = vmatpush.xpose.msra.mxu0 %v315_v26  ;;  %397 = vmatpush.xpose.msra.mxu1 %v316_v27 }
  0x45   : > { %626 = vmatpush.xpose.msra.mxu2 %v313_v28  ;;  %642 = vmatpush.xpose.msra.mxu3 %v314_v29 }
  0x46   : > { %357 = vmatpush.xpose.msra.mxu0 %v313_v28  ;;  %398 = vmatpush.xpose.msra.mxu1 %v314_v29 }
  0x49   : > { %627 = vmatpush.xpose.msra.mxu2 %v311_v30  ;;  %643 = vmatpush.xpose.msra.mxu3 %v312_v31 }
  0x4a   : > { %358 = vmatpush.xpose.msra.mxu0 %v311_v30  ;;  %399 = vmatpush.xpose.msra.mxu1 %v312_v31 }
  0x4c   : > { %371 = vmatmul.f32.vlgmr.msra.gmra.mxu2 %v303_v32  ;;  %412 = vmatmul.f32.vlgmr.msra.gmra.mxu3 %v304_v33 }
  0x4d   : > { %359 = vmatmul.f32.vlgmr.msra.gmra.mxu0 %v295_v34  ;;  %400 = vmatmul.f32.vlgmr.msra.gmra.mxu1 %v296_v35 }
  0x54   : > { %374 = vmatmul.f32.gmra.mxu2 %v305_v36  ;;  %415 = vmatmul.f32.gmra.mxu3 %v306_v37 }
  0x55   : > { %362 = vmatmul.f32.gmra.mxu0 %v297_v38  ;;  %403 = vmatmul.f32.gmra.mxu1 %v298_v39 }
  0x5c   : > { %377 = vmatmul.f32.gmra.mxu2 %v307_v40  ;;  %418 = vmatmul.f32.gmra.mxu3 %v308_v41 }
  0x5d   : > { %365 = vmatmul.f32.gmra.mxu0 %v299_v42  ;;  %406 = vmatmul.f32.gmra.mxu1 %v300_v43 }
  0x64   : > { %380 = vmatmul.f32.gmra.mxu2 %v309_v44  ;;  %421 = vmatmul.f32.gmra.mxu3 %v310_v45 }
  0x65   : > { %368 = vmatmul.f32.gmra.mxu0 %v301_v46  ;;  %409 = vmatmul.f32.gmra.mxu1 %v302_v47 }
  0xca   : > { %v360_v49 = vpop.f32.mrf.mxu0  ;;  %v401_v50 = vpop.f32.mrf.mxu1 }
  0xcb   : > { %v402_v51 = vadd.f32 %v401_v50, %v360_v49 }
  0xcd   : > { %v456_v52 = vadd.f32 %v668_v48, %v402_v51 }
  0xcf   : > { %v372_v53 = vpop.f32.mrf.mxu2  ;;  %v464_v54 = vmax.f32 %v456_v52, 0.0  ;;  %v413_v55 = vpop.f32.mrf.mxu3 }
  0xd0   : > { %v414_v56 = vadd.f32 %v413_v55, %v372_v53 }
  0xd1   : > { %472 = vst [vmem:[%s861_s21] sm:$0xff] %v464_v54 }
  0xd2   : > { %v460_v57 = vadd.f32 %v668_v48, %v414_v56  ;;  %v363_v58 = vpop.f32.mrf.mxu0  ;;  %v404_v59 = vpop.f32.mrf.mxu1 }
  0xd3   : > { %v405_v60 = vadd.f32 %v404_v59, %v363_v58 }
  0xd4   : > { %v468_v61 = vmax.f32 %v460_v57, 0.0 }
  0xd5   : > { %v457_v62 = vadd.f32 %v668_v48, %v405_v60 }
  0xd6   : > { %476 = vst [vmem:[%s861_s21 + $0x20] sm:$0xff] %v468_v61 }
  0xd7   : > { %v375_v63 = vpop.f32.mrf.mxu2  ;;  %v465_v0 = vmax.f32 %v457_v62, 0.0  ;;  %v416_v1 = vpop.f32.mrf.mxu3 }
  0xd8   : > { %v417_v2 = vadd.f32 %v416_v1, %v375_v63 }
  0xd9   : > { %473 = vst [vmem:[%s861_s21 + $0x8] sm:$0xff] %v465_v0 }
  0xda   : > { %v461_v3 = vadd.f32 %v668_v48, %v417_v2  ;;  %v366_v4 = vpop.f32.mrf.mxu0  ;;  %v407_v5 = vpop.f32.mrf.mxu1 }
  0xdb   : > { %v408_v6 = vadd.f32 %v407_v5, %v366_v4 }
  0xdc   : > { %v469_v7 = vmax.f32 %v461_v3, 0.0 }
  0xdd   : > { %v458_v8 = vadd.f32 %v668_v48, %v408_v6 }
  0xde   : > { %477 = vst [vmem:[%s861_s21 + $0x28] sm:$0xff] %v469_v7 }
  0xdf   : > { %v378_v9 = vpop.f32.mrf.mxu2  ;;  %v466_v10 = vmax.f32 %v458_v8, 0.0  ;;  %v419_v11 = vpop.f32.mrf.mxu3 }
  0xe0   : > { %v420_v12 = vadd.f32 %v419_v11, %v378_v9 }
  0xe1   : > { %474 = vst [vmem:[%s861_s21 + $0x10] sm:$0xff] %v466_v10 }
  0xe2   : > { %v462_v13 = vadd.f32 %v668_v48, %v420_v12  ;;  %v369_v14 = vpop.f32.mrf.mxu0  ;;  %v410_v15 = vpop.f32.mrf.mxu1 }
  0xe3   : > { %v411_v16 = vadd.f32 %v410_v15, %v369_v14 }
  0xe4   : > { %v470_v17 = vmax.f32 %v462_v13, 0.0 }
  0xe5   : > { %v459_v18 = vadd.f32 %v668_v48, %v411_v16 }
  0xe6   : > { %478 = vst [vmem:[%s861_s21 + $0x30] sm:$0xff] %v470_v17 }
  0xe7   : > { %v381_v19 = vpop.f32.mrf.mxu2  ;;  %v467_v20 = vmax.f32 %v459_v18, 0.0  ;;  %v422_v21 = vpop.f32.mrf.mxu3 }
  0xe8   : > { %v423_v22 = vadd.f32 %v422_v21, %v381_v19 }
  0xe9   : > { %475 = vst [vmem:[%s861_s21 + $0x18] sm:$0xff] %v467_v20 }
  0xea   : > { %v463_v23 = vadd.f32 %v668_v48, %v423_v22 }
  0xec   : > { %v471_v24 = vmax.f32 %v463_v23, 0.0 }
  0xee   : > { %479 = vst [vmem:[%s861_s21 + $0x38] sm:$0xff] %v471_v24 }
  0xef PF: > { %s13_s14 = sadd.s32 1, %s691_s14   ;;  %s884_s12 = smov %s687_s13 }
  0xf0   : > { %p10_p5 = scmp.ge.s32.totalorder %s13_s14, 4   ;;  %s885_s13 = smov %s887_s15 }
  0xf2   :  { %12 = sbr.rel (!%p10_p5) target bundleno = 2 (0x2), region = 76 }

// kernel: vgg_forward.7
= control target key start
LH: loop header
LB: loop body
LE: loop exit
PB: predicated region body
PF: predicated region fallthrough
CT: control target
= control target key end

     0   :  { %s151_s1 = inlined_call_operand.vmem [shape: f32[128,128], index: 1, kind: input, shape index: {}]   ;;  %s152_s2 = inlined_call_operand.vmem [shape: f32[1,128], index: 2, kind: input, shape index: {}]   ;;  %s153_s0 = inlined_call_operand.vmem [shape: f32[8,128], index: 0, kind: input, shape index: {}]   ;;  %s154_s3 = inlined_call_operand.vmem [shape: f32[8,128], index: 3, kind: output, shape index: {}]  }
   0x1   :  { %v36_v0 = vld [vmem:[%s151_s1 + $0x78] sm:$0xff]  ;;  %v35_v1 = vld [vmem:[%s151_s1 + $0x70] sm:$0xff]  ;;  %v34_v2 = vld [vmem:[%s151_s1 + $0x68] sm:$0xff] }
   0x2   :  { %37 = vmatpush.xpose.msra.mxu0 %v36_v0  ;;  %v33_v3 = vld [vmem:[%s151_s1 + $0x60] sm:$0xff]  ;;  %v32_v4 = vld [vmem:[%s151_s1 + $0x58] sm:$0xff]  ;;  %v31_v5 = vld [vmem:[%s151_s1 + $0x50] sm:$0xff] }
   0x3   :  { %v30_v6 = vld [vmem:[%s151_s1 + $0x48] sm:$0xff]  ;;  %v29_v7 = vld [vmem:[%s151_s1 + $0x40] sm:$0xff]  ;;  %v28_v8 = vld [vmem:[%s151_s1 + $0x38] sm:$0xff] }
   0x4   :  { %v27_v9 = vld [vmem:[%s151_s1 + $0x30] sm:$0xff]  ;;  %v26_v10 = vld [vmem:[%s151_s1 + $0x28] sm:$0xff]  ;;  %v25_v11 = vld [vmem:[%s151_s1 + $0x20] sm:$0xff] }
   0x5   :  { %v24_v12 = vld [vmem:[%s151_s1 + $0x18] sm:$0xff]  ;;  %v23_v13 = vld [vmem:[%s151_s1 + $0x10] sm:$0xff]  ;;  %v22_v14 = vld [vmem:[%s151_s1 + $0x8] sm:$0xff] }
   0x6   :  { %38 = vmatpush.xpose.msra.mxu0 %v35_v1  ;;  %v21_v15 = vld [vmem:[%s151_s1] sm:$0xff] }
   0x7   :  { %v20_v16 = vld [vmem:[%s153_s0] sm:$0xff] }
   0x8   :  { %v73_v17 = vld [vmem:[%s152_s2] ss:$0 sm:$0xff] }
   0xa   :  { %39 = vmatpush.xpose.msra.mxu0 %v34_v2 }
   0xe   :  { %40 = vmatpush.xpose.msra.mxu0 %v33_v3 }
  0x12   :  { %41 = vmatpush.xpose.msra.mxu0 %v32_v4 }
  0x16   :  { %42 = vmatpush.xpose.msra.mxu0 %v31_v5 }
  0x1a   :  { %43 = vmatpush.xpose.msra.mxu0 %v30_v6 }
  0x1e   :  { %44 = vmatpush.xpose.msra.mxu0 %v29_v7 }
  0x22   :  { %45 = vmatpush.xpose.msra.mxu0 %v28_v8 }
  0x26   :  { %46 = vmatpush.xpose.msra.mxu0 %v27_v9 }
  0x2a   :  { %47 = vmatpush.xpose.msra.mxu0 %v26_v10 }
  0x2e   :  { %48 = vmatpush.xpose.msra.mxu0 %v25_v11 }
  0x32   :  { %49 = vmatpush.xpose.msra.mxu0 %v24_v12 }
  0x36   :  { %50 = vmatpush.xpose.msra.mxu0 %v23_v13 }
  0x3a   :  { %51 = vmatpush.xpose.msra.mxu0 %v22_v14 }
  0x3e   :  { %52 = vmatpush.xpose.msra.mxu0 %v21_v15 }
  0x41   :  { %53 = vmatmul.f32.vlgmr.msra.gmra.mxu0 %v20_v16 }
  0xbe   :  { %v54_v18 = vpop.f32.mrf.mxu0 }
  0xbf   :  { %v67_v19 = vadd.f32 %v73_v17, %v54_v18 }
  0xc1   :  { %68 = vst [vmem:[%s154_s3] sm:$0xff] %v67_v19 }

// kernel: vgg_forward.6
= control target key start
LH: loop header
LB: loop body
LE: loop exit
PB: predicated region body
PF: predicated region fallthrough
CT: control target
= control target key end

     0   :  { %s416_s1 = inlined_call_operand.vmem [shape: f32[128,512], index: 1, kind: input, shape index: {}]   ;;  %s417_s0 = inlined_call_operand.vmem [shape: f32[8,512], index: 0, kind: input, shape index: {}]   ;;  %s418_s2 = inlined_call_operand.vmem [shape: f32[1,128], index: 2, kind: input, shape index: {}]   ;;  %s419_s3 = inlined_call_operand.vmem [shape: f32[8,128], index: 3, kind: output, shape index: {}]  }
   0x1   :  { %v86_v0 = vld [vmem:[%s416_s1 + $0x1f0] sm:$0xff]  ;;  %v87_v1 = vld [vmem:[%s416_s1 + $0x1f8] sm:$0xff]  ;;  %v84_v2 = vld [vmem:[%s416_s1 + $0x1e0] sm:$0xff] }
   0x2   :  { %128 = vmatpush.xpose.msra.mxu2 %v86_v0  ;;  %148 = vmatpush.xpose.msra.mxu3 %v87_v1  ;;  %v85_v3 = vld [vmem:[%s416_s1 + $0x1e8] sm:$0xff]  ;;  %v82_v4 = vld [vmem:[%s416_s1 + $0x1d0] sm:$0xff]  ;;  %v83_v5 = vld [vmem:[%s416_s1 + $0x1d8] sm:$0xff] }
   0x3   :  { %88 = vmatpush.xpose.msra.mxu0 %v84_v2  ;;  %108 = vmatpush.xpose.msra.mxu1 %v85_v3  ;;  %v80_v6 = vld [vmem:[%s416_s1 + $0x1c0] sm:$0xff]  ;;  %v81_v7 = vld [vmem:[%s416_s1 + $0x1c8] sm:$0xff]  ;;  %v78_v8 = vld [vmem:[%s416_s1 + $0x1b0] sm:$0xff] }
   0x4   :  { %v79_v9 = vld [vmem:[%s416_s1 + $0x1b8] sm:$0xff]  ;;  %v76_v10 = vld [vmem:[%s416_s1 + $0x1a0] sm:$0xff]  ;;  %v77_v11 = vld [vmem:[%s416_s1 + $0x1a8] sm:$0xff] }
   0x5   :  { %v74_v12 = vld [vmem:[%s416_s1 + $0x190] sm:$0xff]  ;;  %v75_v13 = vld [vmem:[%s416_s1 + $0x198] sm:$0xff]  ;;  %v72_v14 = vld [vmem:[%s416_s1 + $0x180] sm:$0xff] }
   0x6   :  { %129 = vmatpush.xpose.msra.mxu2 %v82_v4  ;;  %149 = vmatpush.xpose.msra.mxu3 %v83_v5  ;;  %v73_v15 = vld [vmem:[%s416_s1 + $0x188] sm:$0xff]  ;;  %v70_v16 = vld [vmem:[%s416_s1 + $0x170] sm:$0xff]  ;;  %v71_v17 = vld [vmem:[%s416_s1 + $0x178] sm:$0xff] }
   0x7   :  { %89 = vmatpush.xpose.msra.mxu0 %v80_v6  ;;  %109 = vmatpush.xpose.msra.mxu1 %v81_v7  ;;  %v68_v18 = vld [vmem:[%s416_s1 + $0x160] sm:$0xff]  ;;  %v69_v19 = vld [vmem:[%s416_s1 + $0x168] sm:$0xff]  ;;  %v66_v20 = vld [vmem:[%s416_s1 + $0x150] sm:$0xff] }
   0x8   :  { %v67_v21 = vld [vmem:[%s416_s1 + $0x158] sm:$0xff]  ;;  %v64_v22 = vld [vmem:[%s416_s1 + $0x140] sm:$0xff]  ;;  %v65_v23 = vld [vmem:[%s416_s1 + $0x148] sm:$0xff] }
   0x9   :  { %v62_v24 = vld [vmem:[%s416_s1 + $0x130] sm:$0xff]  ;;  %v63_v25 = vld [vmem:[%s416_s1 + $0x138] sm:$0xff]  ;;  %v60_v26 = vld [vmem:[%s416_s1 + $0x120] sm:$0xff] }
   0xa   :  { %130 = vmatpush.xpose.msra.mxu2 %v78_v8  ;;  %150 = vmatpush.xpose.msra.mxu3 %v79_v9  ;;  %v61_v27 = vld [vmem:[%s416_s1 + $0x128] sm:$0xff]  ;;  %v58_v28 = vld [vmem:[%s416_s1 + $0x110] sm:$0xff]  ;;  %v59_v29 = vld [vmem:[%s416_s1 + $0x118] sm:$0xff] }
   0xb   :  { %90 = vmatpush.xpose.msra.mxu0 %v76_v10  ;;  %110 = vmatpush.xpose.msra.mxu1 %v77_v11  ;;  %v56_v30 = vld [vmem:[%s416_s1 + $0x100] sm:$0xff]  ;;  %v57_v31 = vld [vmem:[%s416_s1 + $0x108] sm:$0xff]  ;;  %v54_v32 = vld [vmem:[%s416_s1 + $0xf0] sm:$0xff] }
   0xc   :  { %v55_v33 = vld [vmem:[%s416_s1 + $0xf8] sm:$0xff]  ;;  %v52_v34 = vld [vmem:[%s416_s1 + $0xe0] sm:$0xff]  ;;  %v53_v35 = vld [vmem:[%s416_s1 + $0xe8] sm:$0xff] }
   0xd   :  { %v50_v36 = vld [vmem:[%s416_s1 + $0xd0] sm:$0xff]  ;;  %v51_v37 = vld [vmem:[%s416_s1 + $0xd8] sm:$0xff]  ;;  %v48_v38 = vld [vmem:[%s416_s1 + $0xc0] sm:$0xff] }
   0xe   :  { %131 = vmatpush.xpose.msra.mxu2 %v74_v12  ;;  %151 = vmatpush.xpose.msra.mxu3 %v75_v13  ;;  %v49_v39 = vld [vmem:[%s416_s1 + $0xc8] sm:$0xff]  ;;  %v46_v40 = vld [vmem:[%s416_s1 + $0xb0] sm:$0xff]  ;;  %v47_v41 = vld [vmem:[%s416_s1 + $0xb8] sm:$0xff] }
   0xf   :  { %91 = vmatpush.xpose.msra.mxu0 %v72_v14  ;;  %111 = vmatpush.xpose.msra.mxu1 %v73_v15  ;;  %v44_v42 = vld [vmem:[%s416_s1 + $0xa0] sm:$0xff]  ;;  %v45_v43 = vld [vmem:[%s416_s1 + $0xa8] sm:$0xff]  ;;  %v42_v44 = vld [vmem:[%s416_s1 + $0x90] sm:$0xff] }
  0x10   :  { %v43_v45 = vld [vmem:[%s416_s1 + $0x98] sm:$0xff]  ;;  %v40_v46 = vld [vmem:[%s416_s1 + $0x80] sm:$0xff]  ;;  %v41_v47 = vld [vmem:[%s416_s1 + $0x88] sm:$0xff] }
  0x11   :  { %v38_v48 = vld [vmem:[%s416_s1 + $0x70] sm:$0xff]  ;;  %v39_v49 = vld [vmem:[%s416_s1 + $0x78] sm:$0xff]  ;;  %v36_v50 = vld [vmem:[%s416_s1 + $0x60] sm:$0xff] }
  0x12   :  { %132 = vmatpush.xpose.msra.mxu2 %v70_v16  ;;  %152 = vmatpush.xpose.msra.mxu3 %v71_v17  ;;  %v37_v51 = vld [vmem:[%s416_s1 + $0x68] sm:$0xff]  ;;  %v34_v52 = vld [vmem:[%s416_s1 + $0x50] sm:$0xff]  ;;  %v35_v53 = vld [vmem:[%s416_s1 + $0x58] sm:$0xff] }
  0x13   :  { %92 = vmatpush.xpose.msra.mxu0 %v68_v18  ;;  %112 = vmatpush.xpose.msra.mxu1 %v69_v19  ;;  %v32_v54 = vld [vmem:[%s416_s1 + $0x40] sm:$0xff]  ;;  %v33_v55 = vld [vmem:[%s416_s1 + $0x48] sm:$0xff]  ;;  %v30_v56 = vld [vmem:[%s416_s1 + $0x30] sm:$0xff] }
  0x14   :  { %v31_v57 = vld [vmem:[%s416_s1 + $0x38] sm:$0xff]  ;;  %v28_v58 = vld [vmem:[%s416_s1 + $0x20] sm:$0xff]  ;;  %v29_v59 = vld [vmem:[%s416_s1 + $0x28] sm:$0xff] }
  0x15   :  { %v26_v60 = vld [vmem:[%s416_s1 + $0x10] sm:$0xff]  ;;  %v27_v61 = vld [vmem:[%s416_s1 + $0x18] sm:$0xff]  ;;  %v24_v62 = vld [vmem:[%s416_s1] sm:$0xff] }
  0x16   :  { %133 = vmatpush.xpose.msra.mxu2 %v66_v20  ;;  %153 = vmatpush.xpose.msra.mxu3 %v67_v21  ;;  %v25_v63 = vld [vmem:[%s416_s1 + $0x8] sm:$0xff]  ;;  %v22_v0 = vld [vmem:[%s417_s0 + $0x10] sm:$0xff]  ;;  %v23_v1 = vld [vmem:[%s417_s0 + $0x18] sm:$0xff] }
  0x17   :  { %93 = vmatpush.xpose.msra.mxu0 %v64_v22  ;;  %113 = vmatpush.xpose.msra.mxu1 %v65_v23  ;;  %v20_v2 = vld [vmem:[%s417_s0] sm:$0xff]  ;;  %v21_v3 = vld [vmem:[%s417_s0 + $0x8] sm:$0xff] }
  0x18   :  { %v185_v10 = vld [vmem:[%s418_s2] ss:$0 sm:$0xff] }
  0x1a   :  { %134 = vmatpush.xpose.msra.mxu2 %v62_v24  ;;  %154 = vmatpush.xpose.msra.mxu3 %v63_v25 }
  0x1b   :  { %94 = vmatpush.xpose.msra.mxu0 %v60_v26  ;;  %114 = vmatpush.xpose.msra.mxu1 %v61_v27 }
  0x1e   :  { %135 = vmatpush.xpose.msra.mxu2 %v58_v28  ;;  %155 = vmatpush.xpose.msra.mxu3 %v59_v29 }
  0x1f   :  { %95 = vmatpush.xpose.msra.mxu0 %v56_v30  ;;  %115 = vmatpush.xpose.msra.mxu1 %v57_v31 }
  0x22   :  { %136 = vmatpush.xpose.msra.mxu2 %v54_v32  ;;  %156 = vmatpush.xpose.msra.mxu3 %v55_v33 }
  0x23   :  { %96 = vmatpush.xpose.msra.mxu0 %v52_v34  ;;  %116 = vmatpush.xpose.msra.mxu1 %v53_v35 }
  0x26   :  { %137 = vmatpush.xpose.msra.mxu2 %v50_v36  ;;  %157 = vmatpush.xpose.msra.mxu3 %v51_v37 }
  0x27   :  { %97 = vmatpush.xpose.msra.mxu0 %v48_v38  ;;  %117 = vmatpush.xpose.msra.mxu1 %v49_v39 }
  0x2a   :  { %138 = vmatpush.xpose.msra.mxu2 %v46_v40  ;;  %158 = vmatpush.xpose.msra.mxu3 %v47_v41 }
  0x2b   :  { %98 = vmatpush.xpose.msra.mxu0 %v44_v42  ;;  %118 = vmatpush.xpose.msra.mxu1 %v45_v43 }
  0x2e   :  { %139 = vmatpush.xpose.msra.mxu2 %v42_v44  ;;  %159 = vmatpush.xpose.msra.mxu3 %v43_v45 }
  0x2f   :  { %99 = vmatpush.xpose.msra.mxu0 %v40_v46  ;;  %119 = vmatpush.xpose.msra.mxu1 %v41_v47 }
  0x32   :  { %140 = vmatpush.xpose.msra.mxu2 %v38_v48  ;;  %160 = vmatpush.xpose.msra.mxu3 %v39_v49 }
  0x33   :  { %100 = vmatpush.xpose.msra.mxu0 %v36_v50  ;;  %120 = vmatpush.xpose.msra.mxu1 %v37_v51 }
  0x36   :  { %141 = vmatpush.xpose.msra.mxu2 %v34_v52  ;;  %161 = vmatpush.xpose.msra.mxu3 %v35_v53 }
  0x37   :  { %101 = vmatpush.xpose.msra.mxu0 %v32_v54  ;;  %121 = vmatpush.xpose.msra.mxu1 %v33_v55 }
  0x3a   :  { %142 = vmatpush.xpose.msra.mxu2 %v30_v56  ;;  %162 = vmatpush.xpose.msra.mxu3 %v31_v57 }
  0x3b   :  { %102 = vmatpush.xpose.msra.mxu0 %v28_v58  ;;  %122 = vmatpush.xpose.msra.mxu1 %v29_v59 }
  0x3e   :  { %143 = vmatpush.xpose.msra.mxu2 %v26_v60  ;;  %163 = vmatpush.xpose.msra.mxu3 %v27_v61 }
  0x3f   :  { %103 = vmatpush.xpose.msra.mxu0 %v24_v62  ;;  %123 = vmatpush.xpose.msra.mxu1 %v25_v63 }
  0x41   :  { %144 = vmatmul.f32.vlgmr.msra.gmra.mxu2 %v22_v0  ;;  %164 = vmatmul.f32.vlgmr.msra.gmra.mxu3 %v23_v1 }
  0x42   :  { %104 = vmatmul.f32.vlgmr.msra.gmra.mxu0 %v20_v2  ;;  %124 = vmatmul.f32.vlgmr.msra.gmra.mxu1 %v21_v3 }
  0xbf   :  { %v105_v4 = vpop.f32.mrf.mxu0  ;;  %v125_v5 = vpop.f32.mrf.mxu1 }
  0xc0   :  { %v126_v6 = vadd.f32 %v125_v5, %v105_v4 }
  0xc4   :  { %v145_v7 = vpop.f32.mrf.mxu2  ;;  %v165_v8 = vpop.f32.mrf.mxu3 }
  0xc5   :  { %v146_v9 = vadd.f32 %v145_v7, %v126_v6 }
  0xc7   :  { %v166_v11 = vadd.f32 %v165_v8, %v146_v9 }
  0xc9   :  { %v178_v12 = vadd.f32 %v185_v10, %v166_v11 }
  0xcb   :  { %v179_v13 = vmax.f32 %v178_v12, 0.0 }
  0xcd   :  { %180 = vst [vmem:[%s419_s3] sm:$0xff] %v179_v13 }

</bundles_post_ra>
